<compile_context>
chip_gen: v7x
topology: tpu7x:2x2x1
jax: 0.10.0
libtpu: 0.0.40
codegen_flags: <defaults>
</compile_context>

<pallas_src>
import functools

import jax
import jax.numpy as jnp
import numpy as np
from jax.experimental import pallas as pl
from jax.experimental.pallas import tpu as pltpu

EMB = 100   # word embedding dim == conv kernel width in the torch model
NP = 128    # lane-padded width used for emb / conv channels / hidden / output
_NEG = np.float32(-1e30)


def _round8(n):
    return ((n + 7) // 8) * 8


def _deeplocator_kernel(rp_ref, cp_ref, wconv_ref, wfuse_ref, consts_ref,
                        bm_r_ref, bm_c_ref, out_ref, *, Lp_r, Lp_c, block_B):
    def conv_relu_pool(xp_ref, bm_ref, Lp, stream):
        """5 shifted (M,128)x(128,128) MXU matmuls cover all 4 kernel heights
        at once, followed by a single combined bias+mask add, ReLU and a
        per-sample global max pool.  Returns (block_B, NP); cols [0, 4F) are
        meaningful."""
        M = block_B * Lp
        xp = xp_ref[0]                       # (M + 8, NP) bf16; zero tail baked in by prep()
        # dh = 0 initializes the accumulator (no zeros materialization).
        s = jnp.dot(xp[0:M, :], wconv_ref[5 * stream],
                    preferred_element_type=jnp.float32)
        for dh in range(1, 5):
            s = s + jnp.dot(xp[dh:dh + M, :], wconv_ref[5 * stream + dh],
                            preferred_element_type=jnp.float32)
        # Combined conv-bias + validity mask: bm holds the bias at valid
        # (row, column) positions and -1e30 everywhere else (invalid conv rows
        # and padded columns).  ReLU >= 0 therefore zeroes masked entries and
        # the per-sample max pool stays exact.  NOTE: this relies on the
        # activation being ReLU and on zero-filled padded weight columns.
        s3 = s.reshape(block_B, Lp, NP) + bm_ref[...][None, :, :]
        s3 = jnp.maximum(s3, 0.0)
        return jnp.max(s3, axis=1)           # (block_B, NP)

    pooled_r = conv_relu_pool(rp_ref, bm_r_ref, Lp_r, 0)
    pooled_c = conv_relu_pool(cp_ref, bm_c_ref, Lp_c, 1)

    # fusion_text: single K=256 matmul (report / code halves stacked along K).
    pooled = jnp.concatenate([pooled_r, pooled_c], axis=1)     # (block_B, 256)
    out1 = jnp.dot(pooled, wfuse_ref[0:2 * NP],
                   preferred_element_type=jnp.float32) + consts_ref[0]

    # fusion_text_2 folded into fusion_final (W23 = w2 @ w3_h); rec/fre terms
    # are added outside the kernel by the wrapper.
    final = jnp.dot(out1, wfuse_ref[2 * NP:3 * NP],
                    preferred_element_type=jnp.float32) + consts_ref[1]
    out_ref[...] = final                     # lane-dense (block_B, 128) store


def _choose_block_b(B, Lp_r, Lp_c):
    """Batch block size: as large as a conservative VMEM budget allows (bf16
    double-buffered inputs + f32 intermediates), capped at 64, and kept so the
    grid has >= 2 steps when B > 8 (megacore sharding on v7x)."""
    per_sample = (Lp_r + Lp_c) * NP * 12          # ~bytes of VMEM per batch row
    cap = max(8, min(64, (24 * 1024 * 1024 // per_sample) // 8 * 8))
    if B <= 8:
        return 8
    half = _round8((B + 1) // 2)                  # grid >= 2
    return max(8, min(cap, half))


def deeplocator_pallas(r_vec, c_vec, rec, fre, wconv, wfuse, consts,
                       bm_r, bm_c, rf_w):
    B, L_r, emb = r_vec.shape
    L_c = c_vec.shape[1]
    assert emb <= NP
    Lp_r, Lp_c = bm_r.shape[0], bm_c.shape[0]     # multiples of 8, >= L + 8

    block_B = _choose_block_b(B, Lp_r, Lp_c)
    B_pad = -(-B // block_B) * block_B
    grid = B_pad // block_B

    def prep(x, L, Lp):
        # bf16 cast (halves HBM->VMEM bytes) + batch pad + per-sample 4 leading
        # / (Lp-4-L) trailing zero rows + lane pad 100->128, then samples of a
        # block are flattened into one matmul-M axis with 8 trailing zero rows
        # so every shifted conv slice stays in bounds (shifts <= 4 only ever
        # bleed into zero pads, never across samples).
        x = x.astype(jnp.bfloat16)
        x = jnp.pad(x, ((0, B_pad - B), (4, Lp - 4 - L), (0, NP - emb)))
        x = x.reshape(grid, block_B * Lp, NP)
        return jnp.pad(x, ((0, 0), (0, 8), (0, 0)))

    rp = prep(r_vec, L_r, Lp_r)                   # (grid, block_B*Lp_r + 8, NP)
    cp = prep(c_vec, L_c, Lp_c)

    kernel = functools.partial(_deeplocator_kernel, Lp_r=Lp_r, Lp_c=Lp_c,
                               block_B=block_B)

    out = pl.pallas_call(
        kernel,
        out_shape=jax.ShapeDtypeStruct((B_pad, NP), jnp.float32),
        grid=(grid,),
        in_specs=[
            pl.BlockSpec((1, block_B * Lp_r + 8, NP), lambda i: (i, 0, 0)),  # report emb (bf16)
            pl.BlockSpec((1, block_B * Lp_c + 8, NP), lambda i: (i, 0, 0)),  # code emb (bf16)
            pl.BlockSpec(wconv.shape, lambda i: (0, 0, 0)),                  # packed conv W (bf16)
            pl.BlockSpec(wfuse.shape, lambda i: (0, 0)),                     # packed fusion W
            pl.BlockSpec(consts.shape, lambda i: (0, 0)),                    # packed biases
            pl.BlockSpec(bm_r.shape, lambda i: (0, 0)),                      # bias+mask (report)
            pl.BlockSpec(bm_c.shape, lambda i: (0, 0)),                      # bias+mask (code)
        ],
        out_specs=pl.BlockSpec((block_B, NP), lambda i: (i, 0)),
        compiler_params=pltpu.CompilerParams(
            dimension_semantics=("parallel",),
            vmem_limit_bytes=32 * 1024 * 1024),
    )(rp, cp, wconv, wfuse, consts, bm_r, bm_c)

    # rec / fre only enter through the last Linear(3 -> 2): add their (B, 2)
    # contribution outside the kernel (avoids 1-lane-wide kernel inputs).
    text = out[:B, :2]
    return text + rec[:, None] * rf_w[0][None, :] + fre[:, None] * rf_w[1][None, :]


def pack_weights(p, n_kernels, L_r, L_c):
    """Host-side repacking of the torch parameters into kernel layouts."""
    F = n_kernels
    # conv filters: (2 streams * 5 shifts, 128, 128) — each kernel height is
    # right-aligned in its 5-shift slot and occupies its own F output columns.
    wconv = np.zeros((2, 5, NP, NP), np.float32)
    bconv = np.zeros((2, NP), np.float32)
    for s, prefix in enumerate(("r", "c")):
        for ki, kh in enumerate((2, 3, 4, 5)):
            w = np.asarray(p[f"{prefix}_cnn_{ki}_w"])          # (F, 1, kh, EMB)
            b = np.asarray(p[f"{prefix}_cnn_{ki}_b"])          # (F,)
            wt = np.transpose(w[:, 0, :, :], (1, 2, 0))        # (kh, EMB, F)
            wconv[s, 5 - kh:5, :EMB, ki * F:(ki + 1) * F] = wt
            bconv[s, ki * F:(ki + 1) * F] = b
    wconv = jnp.asarray(wconv.reshape(10, NP, NP), jnp.bfloat16)

    # fusion weights packed into one (384, 128) slab:
    #   rows [0:256)   : fusion_text with report/code halves stacked along K
    #   rows [256:384) : fusion_text_2 folded into fusion_final (W23 = w2 @ w3_h)
    w1T = np.asarray(p["fusion_text_w"]).T                     # (8F, 50)
    w2T = np.asarray(p["fusion_text_2_w"]).T                   # (50, 1)
    w3T = np.asarray(p["fusion_final_w"]).T                    # (3, 2)
    wfuse = np.zeros((3 * NP, NP), np.float32)
    wfuse[0:4 * F, :50] = w1T[:4 * F]                          # report half (lanes 0..127)
    wfuse[NP:NP + 4 * F, :50] = w1T[4 * F:]                    # code half   (lanes 128..255)
    wfuse[2 * NP:2 * NP + 50, :2] = w2T @ w3T[0:1]

    # packed small constants: one lane-aligned (8, 128) slab.
    consts = np.zeros((8, NP), np.float32)
    consts[0, :50] = np.asarray(p["fusion_text_b"])            # b1
    consts[1, :2] = (np.asarray(p["fusion_text_2_b"])[0] * w3T[0]
                     + np.asarray(p["fusion_final_b"]))        # b2*w3_h + b3

    # combined per-row conv-bias / validity tables (one per stream):
    #   bm[t, c] = bias[c]  if c < 4F and t < L + kh(c) - 1   (valid conv row)
    #            = -1e30    otherwise (invalid rows and padded columns)
    def biasmask(bias_row, L):
        Lp = _round8(L + 8)
        m = np.full((Lp, NP), _NEG, np.float32)
        for ki in range(4):
            valid = L + ki + 1                                 # output len for kh = ki + 2
            m[:valid, ki * F:(ki + 1) * F] = bias_row[ki * F:(ki + 1) * F]
        return jnp.asarray(m)

    bm_r = biasmask(bconv[0], L_r)
    bm_c = biasmask(bconv[1], L_c)

    rf_w = jnp.asarray(w3T[1:3])                               # (2, 2): rec row, fre row
    return wconv, jnp.asarray(wfuse), jnp.asarray(consts), bm_r, bm_c, rf_w


def reference_forward(r_idx, c_idx, rec, fre, p):
    """Pure-JAX reference with the same semantics as the torch module."""
    r_wi = p["report_emb"][r_idx].astype(jnp.int32)   # .long() trunc (values are exact ints)
    c_wi = p["code_emb"][c_idx].astype(jnp.int32)
    r_vec = p["word_emb"][r_wi]                       # (B, L_r, 100)
    c_vec = p["word_emb"][c_wi]                       # (B, L_c, 100)

    def conv_pool(x, w, bias):
        kh = w.shape[2]
        y = jax.lax.conv_general_dilated(
            x[:, None, :, :], w, window_strides=(1, 1),
            padding=((kh - 1, kh - 1), (0, 0)),
            dimension_numbers=("NCHW", "OIHW", "NCHW"))
        y = y + bias[None, :, None, None]
        y = jnp.maximum(y, 0.0)
        return jnp.max(y[:, :, :, 0], axis=2)          # (B, F)

    r_outs = [conv_pool(r_vec, p[f"r_cnn_{i}_w"], p[f"r_cnn_{i}_b"]) for i in range(4)]
    c_outs = [conv_pool(c_vec, p[f"c_cnn_{i}_w"], p[f"c_cnn_{i}_b"]) for i in range(4)]
    feat = jnp.concatenate(r_outs + c_outs, axis=1)    # (B, 8F)
    h = feat @ p["fusion_text_w"].T + p["fusion_text_b"]
    h = h @ p["fusion_text_2_w"].T + p["fusion_text_2_b"]       # (B, 1)
    v = jnp.concatenate([h, rec[:, None], fre[:, None]], axis=1)
    return v @ p["fusion_final_w"].T + p["fusion_final_b"]      # (B, 2)


if __name__ == "__main__":
    key = jax.random.PRNGKey(0)
    B, L_r, L_c = 2, 16, 16
    vocab, n_reports, n_codes = 32, 6, 6
    F_K = 8  # n_kernels

    ks = jax.random.split(key, 32)
    p = {}
    # frozen embedding tables (report/code tables hold word indices stored as floats)
    p["report_emb"] = jax.random.randint(ks[0], (n_reports, L_r), 1, vocab).astype(jnp.float32)
    p["code_emb"] = jax.random.randint(ks[1], (n_codes, L_c), 1, vocab).astype(jnp.float32)
    p["word_emb"] = jax.random.normal(ks[2], (vocab, EMB), jnp.float32) * 0.1
    # conv stacks
    kidx = 3
    for prefix in ("r", "c"):
        for i, kh in enumerate((2, 3, 4, 5)):
            p[f"{prefix}_cnn_{i}_w"] = jax.random.normal(ks[kidx], (F_K, 1, kh, EMB), jnp.float32) * 0.1
            p[f"{prefix}_cnn_{i}_b"] = jax.random.normal(ks[kidx + 1], (F_K,), jnp.float32) * 0.1
            kidx += 2
    # fusion layers (torch Linear stores weight as (out, in))
    p["fusion_text_w"] = jax.random.normal(ks[kidx], (50, F_K * 8), jnp.float32) * 0.1
    p["fusion_text_b"] = jax.random.normal(ks[kidx + 1], (50,), jnp.float32) * 0.1
    p["fusion_text_2_w"] = jax.random.normal(ks[kidx + 2], (1, 50), jnp.float32) * 0.1
    p["fusion_text_2_b"] = jax.random.normal(ks[kidx + 3], (1,), jnp.float32) * 0.1
    p["fusion_final_w"] = jax.random.normal(ks[kidx + 4], (2, 3), jnp.float32) * 0.1
    p["fusion_final_b"] = jax.random.normal(ks[kidx + 5], (2,), jnp.float32) * 0.1
    # TODO(synk): r_text / c_text Linears exist in __init__ but are unused in forward; skipped.

    # example inputs
    r_idx = jnp.array([1, 4], dtype=jnp.int32)
    c_idx = jnp.array([0, 3], dtype=jnp.int32)
    rec = jax.random.uniform(ks[kidx + 6], (B,), jnp.float32)
    fre = jax.random.uniform(ks[kidx + 7], (B,), jnp.float32)

    # ---- JAX glue: embedding lookups (gathers) + host-side weight packing ----
    r_wi = p["report_emb"][r_idx].astype(jnp.int32)
    c_wi = p["code_emb"][c_idx].astype(jnp.int32)
    r_vec = p["word_emb"][r_wi]                       # (B, L_r, 100)
    c_vec = p["word_emb"][c_wi]                       # (B, L_c, 100)

    wconv, wfuse, consts, bm_r, bm_c, rf_w = pack_weights(p, F_K, L_r, L_c)

    run = jax.jit(deeplocator_pallas)
    out = jax.block_until_ready(
        run(r_vec, c_vec, rec, fre, wconv, wfuse, consts, bm_r, bm_c, rf_w))

    ref = jax.block_until_ready(reference_forward(r_idx, c_idx, rec, fre, p))
    # conv matmuls run on the MXU in bf16 with f32 accumulation -> slightly
    # looser tolerance than pure f32.
    np.testing.assert_allclose(np.asarray(out), np.asarray(ref), rtol=2e-3, atol=2e-3)
    print("KERNEL_OK")
</pallas_src>

<mosaic_0001>
module attributes {stable_mosaic.version = 11 : i64} {
  func.func @_deeplocator_kernel(%arg0: i32, %arg1: memref<1x200x128xbf16, #tpu.memory_space<vmem>>, %arg2: memref<1x200x128xbf16, #tpu.memory_space<vmem>>, %arg3: memref<10x128x128xbf16, #tpu.memory_space<vmem>>, %arg4: memref<384x128xf32, #tpu.memory_space<vmem>>, %arg5: memref<8x128xf32, #tpu.memory_space<vmem>>, %arg6: memref<24x128xf32, #tpu.memory_space<vmem>>, %arg7: memref<24x128xf32, #tpu.memory_space<vmem>>, %arg8: memref<8x128xf32, #tpu.memory_space<vmem>>) attributes {dimension_semantics = [#tpu.dimension_semantics<parallel>], iteration_bounds = array<i64: 1>, scalar_prefetch = 0 : i64, scratch_operands = 0 : i64, tpu.core_type = #tpu.core_type<tc>, window_params = [{transform_indices = @transform_0, window_bounds = array<i64: 1, 200, 128>}, {transform_indices = @transform_1, window_bounds = array<i64: 1, 200, 128>}, {pipeline_mode = #tpu.pipeline_mode<synchronous>, transform_indices = @transform_2, window_bounds = array<i64: 10, 128, 128>}, {pipeline_mode = #tpu.pipeline_mode<synchronous>, transform_indices = @transform_3, window_bounds = array<i64: 384, 128>}, {pipeline_mode = #tpu.pipeline_mode<synchronous>, transform_indices = @transform_4, window_bounds = array<i64: 8, 128>}, {pipeline_mode = #tpu.pipeline_mode<synchronous>, transform_indices = @transform_5, window_bounds = array<i64: 24, 128>}, {pipeline_mode = #tpu.pipeline_mode<synchronous>, transform_indices = @transform_6, window_bounds = array<i64: 24, 128>}, {transform_indices = @transform_7, window_bounds = array<i64: 8, 128>}]} {
    %c0 = arith.constant 0 : index
    %c0_0 = arith.constant 0 : index
    %c0_1 = arith.constant 0 : index
    %0 = vector.load %arg1[%c0, %c0_0, %c0_1] : memref<1x200x128xbf16, #tpu.memory_space<vmem>>, vector<1x200x128xbf16>
    %1 = vector.shape_cast %0 : vector<1x200x128xbf16> to vector<200x128xbf16>
    %2 = vector.extract_strided_slice %1 {offsets = [0, 0], sizes = [192, 128], strides = [1, 1]} : vector<200x128xbf16> to vector<192x128xbf16>
    %c0_2 = arith.constant 0 : index
    %c0_3 = arith.constant 0 : index
    %c0_4 = arith.constant 0 : index
    %3 = vector.load %arg3[%c0_2, %c0_3, %c0_4] : memref<10x128x128xbf16, #tpu.memory_space<vmem>>, vector<1x128x128xbf16>
    %4 = vector.shape_cast %3 : vector<1x128x128xbf16> to vector<128x128xbf16>
    %cst = arith.constant dense<0.000000e+00> : vector<192x128xf32>
    %5 = tpu.matmul %2, %4, %cst {dimension_numbers = #tpu.dot_dimension_numbers<[1], [0], [0], [1], [0, 0, 1, 1], [], []>} : vector<192x128xbf16>, vector<128x128xbf16>, vector<192x128xf32> -> vector<192x128xf32>
    %6 = vector.extract_strided_slice %1 {offsets = [1, 0], sizes = [192, 128], strides = [1, 1]} : vector<200x128xbf16> to vector<192x128xbf16>
    %c1 = arith.constant 1 : index
    %c0_5 = arith.constant 0 : index
    %c0_6 = arith.constant 0 : index
    %7 = vector.load %arg3[%c1, %c0_5, %c0_6] : memref<10x128x128xbf16, #tpu.memory_space<vmem>>, vector<1x128x128xbf16>
    %8 = vector.shape_cast %7 : vector<1x128x128xbf16> to vector<128x128xbf16>
    %cst_7 = arith.constant dense<0.000000e+00> : vector<192x128xf32>
    %9 = tpu.matmul %6, %8, %cst_7 {dimension_numbers = #tpu.dot_dimension_numbers<[1], [0], [0], [1], [0, 0, 1, 1], [], []>} : vector<192x128xbf16>, vector<128x128xbf16>, vector<192x128xf32> -> vector<192x128xf32>
    %10 = arith.addf %5, %9 : vector<192x128xf32>
    %11 = vector.extract_strided_slice %1 {offsets = [2, 0], sizes = [192, 128], strides = [1, 1]} : vector<200x128xbf16> to vector<192x128xbf16>
    %c2 = arith.constant 2 : index
    %c0_8 = arith.constant 0 : index
    %c0_9 = arith.constant 0 : index
    %12 = vector.load %arg3[%c2, %c0_8, %c0_9] : memref<10x128x128xbf16, #tpu.memory_space<vmem>>, vector<1x128x128xbf16>
    %13 = vector.shape_cast %12 : vector<1x128x128xbf16> to vector<128x128xbf16>
    %cst_10 = arith.constant dense<0.000000e+00> : vector<192x128xf32>
    %14 = tpu.matmul %11, %13, %cst_10 {dimension_numbers = #tpu.dot_dimension_numbers<[1], [0], [0], [1], [0, 0, 1, 1], [], []>} : vector<192x128xbf16>, vector<128x128xbf16>, vector<192x128xf32> -> vector<192x128xf32>
    %15 = arith.addf %10, %14 : vector<192x128xf32>
    %16 = vector.extract_strided_slice %1 {offsets = [3, 0], sizes = [192, 128], strides = [1, 1]} : vector<200x128xbf16> to vector<192x128xbf16>
    %c3 = arith.constant 3 : index
    %c0_11 = arith.constant 0 : index
    %c0_12 = arith.constant 0 : index
    %17 = vector.load %arg3[%c3, %c0_11, %c0_12] : memref<10x128x128xbf16, #tpu.memory_space<vmem>>, vector<1x128x128xbf16>
    %18 = vector.shape_cast %17 : vector<1x128x128xbf16> to vector<128x128xbf16>
    %cst_13 = arith.constant dense<0.000000e+00> : vector<192x128xf32>
    %19 = tpu.matmul %16, %18, %cst_13 {dimension_numbers = #tpu.dot_dimension_numbers<[1], [0], [0], [1], [0, 0, 1, 1], [], []>} : vector<192x128xbf16>, vector<128x128xbf16>, vector<192x128xf32> -> vector<192x128xf32>
    %20 = arith.addf %15, %19 : vector<192x128xf32>
    %21 = vector.extract_strided_slice %1 {offsets = [4, 0], sizes = [192, 128], strides = [1, 1]} : vector<200x128xbf16> to vector<192x128xbf16>
    %c4 = arith.constant 4 : index
    %c0_14 = arith.constant 0 : index
    %c0_15 = arith.constant 0 : index
    %22 = vector.load %arg3[%c4, %c0_14, %c0_15] : memref<10x128x128xbf16, #tpu.memory_space<vmem>>, vector<1x128x128xbf16>
    %23 = vector.shape_cast %22 : vector<1x128x128xbf16> to vector<128x128xbf16>
    %cst_16 = arith.constant dense<0.000000e+00> : vector<192x128xf32>
    %24 = tpu.matmul %21, %23, %cst_16 {dimension_numbers = #tpu.dot_dimension_numbers<[1], [0], [0], [1], [0, 0, 1, 1], [], []>} : vector<192x128xbf16>, vector<128x128xbf16>, vector<192x128xf32> -> vector<192x128xf32>
    %25 = arith.addf %20, %24 : vector<192x128xf32>
    %26 = vector.shape_cast %25 : vector<192x128xf32> to vector<8x24x128xf32>
    %c0_17 = arith.constant 0 : index
    %c0_18 = arith.constant 0 : index
    %27 = vector.load %arg6[%c0_17, %c0_18] : memref<24x128xf32, #tpu.memory_space<vmem>>, vector<24x128xf32>
    %28 = vector.shape_cast %27 : vector<24x128xf32> to vector<1x24x128xf32>
    %29 = vector.broadcast %28 : vector<1x24x128xf32> to vector<8x24x128xf32>
    %30 = arith.addf %26, %29 : vector<8x24x128xf32>
    %cst_19 = arith.constant 0.000000e+00 : f32
    %31 = vector.broadcast %cst_19 : f32 to vector<8x24x128xf32>
    %32 = arith.maximumf %30, %31 : vector<8x24x128xf32>
    %cst_20 = arith.constant dense<0xFF800000> : vector<8x128xf32>
    %33 = vector.multi_reduction <maximumf>, %32, %cst_20 [1] : vector<8x24x128xf32> to vector<8x128xf32>
    %c0_21 = arith.constant 0 : index
    %c0_22 = arith.constant 0 : index
    %c0_23 = arith.constant 0 : index
    %34 = vector.load %arg2[%c0_21, %c0_22, %c0_23] : memref<1x200x128xbf16, #tpu.memory_space<vmem>>, vector<1x200x128xbf16>
    %35 = vector.shape_cast %34 : vector<1x200x128xbf16> to vector<200x128xbf16>
    %36 = vector.extract_strided_slice %35 {offsets = [0, 0], sizes = [192, 128], strides = [1, 1]} : vector<200x128xbf16> to vector<192x128xbf16>
    %c5 = arith.constant 5 : index
    %c0_24 = arith.constant 0 : index
    %c0_25 = arith.constant 0 : index
    %37 = vector.load %arg3[%c5, %c0_24, %c0_25] : memref<10x128x128xbf16, #tpu.memory_space<vmem>>, vector<1x128x128xbf16>
    %38 = vector.shape_cast %37 : vector<1x128x128xbf16> to vector<128x128xbf16>
    %cst_26 = arith.constant dense<0.000000e+00> : vector<192x128xf32>
    %39 = tpu.matmul %36, %38, %cst_26 {dimension_numbers = #tpu.dot_dimension_numbers<[1], [0], [0], [1], [0, 0, 1, 1], [], []>} : vector<192x128xbf16>, vector<128x128xbf16>, vector<192x128xf32> -> vector<192x128xf32>
    %40 = vector.extract_strided_slice %35 {offsets = [1, 0], sizes = [192, 128], strides = [1, 1]} : vector<200x128xbf16> to vector<192x128xbf16>
    %c6 = arith.constant 6 : index
    %c0_27 = arith.constant 0 : index
    %c0_28 = arith.constant 0 : index
    %41 = vector.load %arg3[%c6, %c0_27, %c0_28] : memref<10x128x128xbf16, #tpu.memory_space<vmem>>, vector<1x128x128xbf16>
    %42 = vector.shape_cast %41 : vector<1x128x128xbf16> to vector<128x128xbf16>
    %cst_29 = arith.constant dense<0.000000e+00> : vector<192x128xf32>
    %43 = tpu.matmul %40, %42, %cst_29 {dimension_numbers = #tpu.dot_dimension_numbers<[1], [0], [0], [1], [0, 0, 1, 1], [], []>} : vector<192x128xbf16>, vector<128x128xbf16>, vector<192x128xf32> -> vector<192x128xf32>
    %44 = arith.addf %39, %43 : vector<192x128xf32>
    %45 = vector.extract_strided_slice %35 {offsets = [2, 0], sizes = [192, 128], strides = [1, 1]} : vector<200x128xbf16> to vector<192x128xbf16>
    %c7 = arith.constant 7 : index
    %c0_30 = arith.constant 0 : index
    %c0_31 = arith.constant 0 : index
    %46 = vector.load %arg3[%c7, %c0_30, %c0_31] : memref<10x128x128xbf16, #tpu.memory_space<vmem>>, vector<1x128x128xbf16>
    %47 = vector.shape_cast %46 : vector<1x128x128xbf16> to vector<128x128xbf16>
    %cst_32 = arith.constant dense<0.000000e+00> : vector<192x128xf32>
    %48 = tpu.matmul %45, %47, %cst_32 {dimension_numbers = #tpu.dot_dimension_numbers<[1], [0], [0], [1], [0, 0, 1, 1], [], []>} : vector<192x128xbf16>, vector<128x128xbf16>, vector<192x128xf32> -> vector<192x128xf32>
    %49 = arith.addf %44, %48 : vector<192x128xf32>
    %50 = vector.extract_strided_slice %35 {offsets = [3, 0], sizes = [192, 128], strides = [1, 1]} : vector<200x128xbf16> to vector<192x128xbf16>
    %c8 = arith.constant 8 : index
    %c0_33 = arith.constant 0 : index
    %c0_34 = arith.constant 0 : index
    %51 = vector.load %arg3[%c8, %c0_33, %c0_34] : memref<10x128x128xbf16, #tpu.memory_space<vmem>>, vector<1x128x128xbf16>
    %52 = vector.shape_cast %51 : vector<1x128x128xbf16> to vector<128x128xbf16>
    %cst_35 = arith.constant dense<0.000000e+00> : vector<192x128xf32>
    %53 = tpu.matmul %50, %52, %cst_35 {dimension_numbers = #tpu.dot_dimension_numbers<[1], [0], [0], [1], [0, 0, 1, 1], [], []>} : vector<192x128xbf16>, vector<128x128xbf16>, vector<192x128xf32> -> vector<192x128xf32>
    %54 = arith.addf %49, %53 : vector<192x128xf32>
    %55 = vector.extract_strided_slice %35 {offsets = [4, 0], sizes = [192, 128], strides = [1, 1]} : vector<200x128xbf16> to vector<192x128xbf16>
    %c9 = arith.constant 9 : index
    %c0_36 = arith.constant 0 : index
    %c0_37 = arith.constant 0 : index
    %56 = vector.load %arg3[%c9, %c0_36, %c0_37] : memref<10x128x128xbf16, #tpu.memory_space<vmem>>, vector<1x128x128xbf16>
    %57 = vector.shape_cast %56 : vector<1x128x128xbf16> to vector<128x128xbf16>
    %cst_38 = arith.constant dense<0.000000e+00> : vector<192x128xf32>
    %58 = tpu.matmul %55, %57, %cst_38 {dimension_numbers = #tpu.dot_dimension_numbers<[1], [0], [0], [1], [0, 0, 1, 1], [], []>} : vector<192x128xbf16>, vector<128x128xbf16>, vector<192x128xf32> -> vector<192x128xf32>
    %59 = arith.addf %54, %58 : vector<192x128xf32>
    %60 = vector.shape_cast %59 : vector<192x128xf32> to vector<8x24x128xf32>
    %c0_39 = arith.constant 0 : index
    %c0_40 = arith.constant 0 : index
    %61 = vector.load %arg7[%c0_39, %c0_40] : memref<24x128xf32, #tpu.memory_space<vmem>>, vector<24x128xf32>
    %62 = vector.shape_cast %61 : vector<24x128xf32> to vector<1x24x128xf32>
    %63 = vector.broadcast %62 : vector<1x24x128xf32> to vector<8x24x128xf32>
    %64 = arith.addf %60, %63 : vector<8x24x128xf32>
    %cst_41 = arith.constant 0.000000e+00 : f32
    %65 = vector.broadcast %cst_41 : f32 to vector<8x24x128xf32>
    %66 = arith.maximumf %64, %65 : vector<8x24x128xf32>
    %cst_42 = arith.constant dense<0xFF800000> : vector<8x128xf32>
    %67 = vector.multi_reduction <maximumf>, %66, %cst_42 [1] : vector<8x24x128xf32> to vector<8x128xf32>
    %68 = tpu.concatenate %33, %67 in 1 : vector<8x128xf32>, vector<8x128xf32> -> vector<8x256xf32>
    %c0_43 = arith.constant 0 : index
    %c0_44 = arith.constant 0 : index
    %69 = vector.load %arg4[%c0_43, %c0_44] : memref<384x128xf32, #tpu.memory_space<vmem>>, vector<256x128xf32>
    %cst_45 = arith.constant dense<0.000000e+00> : vector<8x128xf32>
    %70 = tpu.matmul %68, %69, %cst_45 {dimension_numbers = #tpu.dot_dimension_numbers<[1], [0], [0], [1], [0, 0, 1, 1], [], []>} : vector<8x256xf32>, vector<256x128xf32>, vector<8x128xf32> -> vector<8x128xf32>
    %c0_46 = arith.constant 0 : index
    %c0_47 = arith.constant 0 : index
    %71 = vector.load %arg5[%c0_46, %c0_47] : memref<8x128xf32, #tpu.memory_space<vmem>>, vector<1x128xf32>
    %72 = vector.shape_cast %71 : vector<1x128xf32> to vector<128xf32>
    %73 = vector.shape_cast %72 : vector<128xf32> to vector<1x128xf32>
    %74 = vector.broadcast %73 : vector<1x128xf32> to vector<8x128xf32>
    %75 = arith.addf %70, %74 : vector<8x128xf32>
    %c256 = arith.constant 256 : index
    %c0_48 = arith.constant 0 : index
    %76 = vector.load %arg4[%c256, %c0_48] : memref<384x128xf32, #tpu.memory_space<vmem>>, vector<128x128xf32>
    %cst_49 = arith.constant dense<0.000000e+00> : vector<8x128xf32>
    %77 = tpu.matmul %75, %76, %cst_49 {dimension_numbers = #tpu.dot_dimension_numbers<[1], [0], [0], [1], [0, 0, 1, 1], [], []>} : vector<8x128xf32>, vector<128x128xf32>, vector<8x128xf32> -> vector<8x128xf32>
    %c1_50 = arith.constant 1 : index
    %c0_51 = arith.constant 0 : index
    %78 = vector.load %arg5[%c1_50, %c0_51] : memref<8x128xf32, #tpu.memory_space<vmem>>, vector<1x128xf32>
    %79 = vector.shape_cast %78 : vector<1x128xf32> to vector<128xf32>
    %80 = vector.shape_cast %79 : vector<128xf32> to vector<1x128xf32>
    %81 = vector.broadcast %80 : vector<1x128xf32> to vector<8x128xf32>
    %82 = arith.addf %77, %81 : vector<8x128xf32>
    %c0_52 = arith.constant 0 : index
    %c0_53 = arith.constant 0 : index
    %83 = vector.load %arg8[%c0_52, %c0_53] : memref<8x128xf32, #tpu.memory_space<vmem>>, vector<8x128xf32>
    tpu.vector_store %arg8[%c0_52, %c0_53], %82 {strides = array<i32>} : memref<8x128xf32, #tpu.memory_space<vmem>>, vector<8x128xf32>,
    return
  }
  func.func @transform_0(%arg0: i32) -> (i32, i32, i32) {
    %c0_i32 = arith.constant 0 : i32
    %c0_i32_0 = arith.constant 0 : i32
    %c0_i32_1 = arith.constant 0 : i32
    return %arg0, %c0_i32, %c0_i32_0 : i32, i32, i32
  }
  func.func @transform_1(%arg0: i32) -> (i32, i32, i32) {
    %c0_i32 = arith.constant 0 : i32
    %c0_i32_0 = arith.constant 0 : i32
    %c0_i32_1 = arith.constant 0 : i32
    return %arg0, %c0_i32, %c0_i32_0 : i32, i32, i32
  }
  func.func @transform_2(%arg0: i32) -> (i32, i32, i32) {
    %c0_i32 = arith.constant 0 : i32
    %c0_i32_0 = arith.constant 0 : i32
    %c0_i32_1 = arith.constant 0 : i32
    %c0_i32_2 = arith.constant 0 : i32
    return %c0_i32, %c0_i32_0, %c0_i32_1 : i32, i32, i32
  }
  func.func @transform_3(%arg0: i32) -> (i32, i32) {
    %c0_i32 = arith.constant 0 : i32
    %c0_i32_0 = arith.constant 0 : i32
    %c0_i32_1 = arith.constant 0 : i32
    return %c0_i32, %c0_i32_0 : i32, i32
  }
  func.func @transform_4(%arg0: i32) -> (i32, i32) {
    %c0_i32 = arith.constant 0 : i32
    %c0_i32_0 = arith.constant 0 : i32
    %c0_i32_1 = arith.constant 0 : i32
    return %c0_i32, %c0_i32_0 : i32, i32
  }
  func.func @transform_5(%arg0: i32) -> (i32, i32) {
    %c0_i32 = arith.constant 0 : i32
    %c0_i32_0 = arith.constant 0 : i32
    %c0_i32_1 = arith.constant 0 : i32
    return %c0_i32, %c0_i32_0 : i32, i32
  }
  func.func @transform_6(%arg0: i32) -> (i32, i32) {
    %c0_i32 = arith.constant 0 : i32
    %c0_i32_0 = arith.constant 0 : i32
    %c0_i32_1 = arith.constant 0 : i32
    return %c0_i32, %c0_i32_0 : i32, i32
  }
  func.func @transform_7(%arg0: i32) -> (i32, i32) {
    %c0_i32 = arith.constant 0 : i32
    %c0_i32_0 = arith.constant 0 : i32
    return %arg0, %c0_i32 : i32, i32
  }
}

</mosaic_0001>

<bundles_post_ra>
// kernel: deeplocator_pallas.1
= control target key start
LH: loop header
LB: loop body
LE: loop exit
PB: predicated region body
PF: predicated region fallthrough
CT: control target
= control target key end

     0   :  { %12 = vsyncpa [#allocation3], 0  ;;  %s5803_s0 = inlined_call_operand.vmem [shape: bf16[1,200,128], index: 0, kind: input, shape index: {}]   ;;  %s5804_s1 = inlined_call_operand.vmem [shape: bf16[1,200,128], index: 1, kind: input, shape index: {}]   ;;  %s5805_s2 = inlined_call_operand.vmem [shape: bf16[10,128,128], index: 2, kind: input, shape index: {}]   ;;  %s5806_s3 = inlined_call_operand.hbm [shape: f32[384,128], index: 3, kind: input, shape index: {}]   ;;  %s5807_s4 = inlined_call_operand.hbm [shape: f32[8,128], index: 4, kind: input, shape index: {}]   ;;  %s5808_s5 = inlined_call_operand.vmem [shape: f32[24,128], index: 5, kind: input, shape index: {}]   ;;  %s5809_s6 = inlined_call_operand.vmem [shape: f32[24,128], index: 6, kind: input, shape index: {}]   ;;  %s5810_s7 = inlined_call_operand.vmem [shape: f32[8,128], index: 7, kind: output, shape index: {}]  }
   0x1   :  { %13 = vsyncpa [#allocation5], 0  ;;  %s4690_s24 = smov [#allocation2]   ;;  %s4642_s28 = scalar_lea.hbm %s5806_s3, 6144 }
   0x2   :  { %s25_s25 = sshll.u32 %s4690_s24, 4  ;;  %p4643_p0 = scmp.ne.s32.totalorder %s5806_s3, %s4642_s28  ;;  %s26_s25 = int_to_ptr.vmem [resolvable:$true] %s25_s25 }
   0x3   :  { %p4646_p1 = scmp.lt.u32.totalorder %s4642_s28, %s5806_s3 }
   0x5   :  { %p4648_p2 = pnand %p4646_p1, %p4643_p0 }
   0x7   :  { %4651 = shalt.err (!%p4648_p2)
}
   0x8   :  { %s4652_s10 = scalar_lea.vmem %s26_s25, 6144  ;;  %p4657_p4 = scmp.lt.s32.totalorder %s26_s25, %s26_s25 }
   0x9   :  { %p4653_p3 = scmp.ne.s32.totalorder %s26_s25, %s4652_s10  ;;  %p4658_p5 = scmp.lt.s32.totalorder %s4652_s10, %s4652_s10 }
   0xb   :  { %p4659_p6 = por %p4658_p5, %p4657_p4 }
   0xd   :  { %p4660_p7 = pnand %p4659_p6, %p4653_p3 }
   0xf   :  { %4663 = shalt.err (!%p4660_p7)
}
  0x10   :  { %s4691_s11 = smov 128   ;;  %s4692_s12 = smov 8  }
  0x11   :  { %31 = dma.hbm_to_vmem [thread:$0]  %s5806_s3, 6144, %s26_s25, [#allocation3], %s4691_s11, %s4691_s11, %s4692_s12  }
  0x12   :  { %s4693_s15 = smov [#allocation4]   ;;  %s4664_s19 = scalar_lea.hbm %s5807_s4, 128 }
  0x13   :  { %s38_s16 = sshll.u32 %s4693_s15, 4  ;;  %p4665_p8 = scmp.ne.s32.totalorder %s5807_s4, %s4664_s19  ;;  %s39_s16 = int_to_ptr.vmem [resolvable:$true] %s38_s16 }
  0x14   :  { %p4668_p9 = scmp.lt.u32.totalorder %s4664_s19, %s5807_s4 }
  0x16   :  { %p4670_p10 = pnand %p4668_p9, %p4665_p8 }
  0x18   :  { %4673 = shalt.err (!%p4670_p10)
}
  0x19   :  { %s4674_s24 = scalar_lea.vmem %s39_s16, 128  ;;  %p4679_p12 = scmp.lt.s32.totalorder %s39_s16, %s39_s16 }
  0x1a   :  { %p4675_p11 = scmp.ne.s32.totalorder %s39_s16, %s4674_s24  ;;  %p4680_p13 = scmp.lt.s32.totalorder %s4674_s24, %s4674_s24 }
  0x1c   :  { %p4681_p0 = por %p4680_p13, %p4679_p12 }
  0x1e   :  { %p4682_p1 = pnand %p4681_p0, %p4675_p11 }
  0x20   :  { %4685 = shalt.err (!%p4682_p1)
}
  0x21   :  { %41 = dma.hbm_to_vmem [thread:$0]  %s5807_s4, 128, %s39_s16, [#allocation5]  }
  0x22   :  { %4686 = dma.done.wait [#allocation3], 6144  }
  0x23   :  { %4687 = vsyncadd [#allocation3], 4294961152 }
  0x24   :  { %4688 = dma.done.wait [#allocation5], 128  }
  0x25   :  { %4689 = vsyncadd [#allocation5], 4294967168  ;;  %v4510_v0 = vld [vmem:[%s5805_s2 + $0x40] sm:$0xff]   ;;  %v4512_v2 = vld [vmem:[%s5805_s2 + $0x48] sm:$0xff]   ;;  %vm174_vm0 = vsmask.f32 7424 }
  0x26   :  { %v4511_v1 = vld [vmem:[%s5805_s2 + $0x180] sm:$0xff]   ;;  %3820 = vmatprep.subr.bf16.mxu0 %v4510_v0  ;;  %v4513_v3 = vld [vmem:[%s5805_s2 + $0x188] sm:$0xff]   ;;  %v4514_v4 = vld [vmem:[%s5805_s2 + $0x50] sm:$0xff]   ;;  %vm926_vm1 = vsmask.f32 6400  ;;  %vm670_vm2 = vcmask 1046528  }
  0x27   :  { %4020 = vmatprep.subr.bf16.mxu1 %v4511_v1  ;;  %3821 = vmatpush3.bf16.msra.mxu0 %v4510_v0  ;;  %v4515_v5 = vld [vmem:[%s5805_s2 + $0x190] sm:$0xff]   ;;  %v4516_v6 = vld [vmem:[%s5805_s2 + $0x58] sm:$0xff]   ;;  %v4518_v8 = vld [vmem:[%s5805_s2 + $0x60] sm:$0xff]   ;;  %vm1210_vm3 = vcmask 1045504   ;;  %vm3080_vm4 = vcmask 1041409   ;;  %vm3082_vm5 = vcmask 1042434  }
  0x28   :  { %4021 = vmatpush3.bf16.msra.mxu1 %v4511_v1  ;;  %3822 = vmatprep.subr.bf16.mxu0 %v4512_v2  ;;  %v4517_v7 = vld [vmem:[%s5805_s2 + $0x198] sm:$0xff]   ;;  %v4519_v9 = vld [vmem:[%s5805_s2 + $0x1a0] sm:$0xff]   ;;  %v4520_v10 = vld [vmem:[%s5805_s2 + $0x68] sm:$0xff]   ;;  %vm3084_vm6 = vcmask 1043459   ;;  %vm3086_vm7 = vcmask 1044484   ;;  %vm3088_vm8 = vcmask 1045509  }
  0x29   :  { %4022 = vmatprep.subr.bf16.mxu1 %v4513_v3  ;;  %v4521_v11 = vld [vmem:[%s5805_s2 + $0x1a8] sm:$0xff]   ;;  %v4800_v12 = vld [vmem:[%s5803_s0] sm:$0xff]   ;;  %v4522_v14 = vld [vmem:[%s5805_s2 + $0x70] sm:$0xff]   ;;  %vm3090_vm9 = vcmask 1046534   ;;  %vm3092_vm10 = vcmask 1047559   ;;  %vm4695_vm11 = vmmov 0  }
  0x2a   :  { %v4805_v13 = vld [vmem:[%s5803_s0 + $0x8] sm:$0xff]   ;;  %v4523_v15 = vld [vmem:[%s5805_s2 + $0x1b0] sm:$0xff]   ;;  %v5822_v16 = vshrl.u32 %v4800_v12, 16  ;;  %v5821_v17 = vshll.u32 %v4800_v12, 16  ;;  %v4819_v19 = vld [vmem:[%s5804_s1] sm:$0xff]  }
  0x2b   :  { %3823 = vmatpush3.bf16.msra.mxu0 %v4512_v2  ;;  %v5819_v18 = vshll.u32 %v4805_v13, 16  ;;  %v4824_v20 = vld [vmem:[%s5804_s1 + $0x8] sm:$0xff]   ;;  %v5818_v23 = vshrl.u32 %v4819_v19, 16  ;;  %v5817_v24 = vshll.u32 %v4819_v19, 16  ;;  %v4835_v25 = vld [vmem:[%s5803_s0 + $0x10] sm:$0xff]   ;;  %v5820_v28 = vshrl.u32 %v4805_v13, 16 }
  0x2c   :  { %4023 = vmatpush3.bf16.msra.mxu1 %v4513_v3  ;;  %3824 = vmatprep.subr.bf16.mxu0 %v4514_v4  ;;  %v180_v21 = vrot.slane %v5821_v17, 1  ;;  %v4840_v26 = vld [vmem:[%s5804_s1 + $0x10] sm:$0xff]   ;;  %v5815_v27 = vshll.u32 %v4824_v20, 16  ;;  %v191_v31 = vshll.u32 %v4835_v25, 16  ;;  %v4524_v32 = vld [vmem:[%s5805_s2 + $0x78] sm:$0xff]   ;;  %v5816_v34 = vshrl.u32 %v4824_v20, 16 }
  0x2d   :  { %4024 = vmatprep.subr.bf16.mxu1 %v4515_v5  ;;  %v185_v22 = vrot.slane %v5819_v18, 1  ;;  %v1691_v30 = vrot.slane %v5817_v24, 1  ;;  %v1702_v35 = vshll.u32 %v4840_v26, 16  ;;  %v4525_v36 = vld [vmem:[%s5805_s2 + $0x1b8] sm:$0xff]   ;;  %v4533_v41 = vld [vmem:[%s5805_s2] sm:$0xff]   ;;  %v195_v47 = vshrl.u32 %v4835_v25, 16 }
  0x2e   :  { %v181_v29 = vor.u32 %v180_v21, %v5822_v16  ;;  %v1696_v33 = vrot.slane %v5815_v27, 1  ;;  %v193_v39 = vrot.slane %v191_v31, 1  ;;  %v4862_v40 = vrot.slane %v191_v31, 2  ;;  %v4870_v42 = vld [vmem:[%s5803_s0 + $0x18] sm:$0xff]   ;;  %v4532_v46 = vld [vmem:[%s5805_s2 + $0x140] sm:$0xff]   ;;  %v4534_v57 = vld [vmem:[%s5805_s2 + $0x148] sm:$0xff]  }
  0x2f   :  { %3825 = vmatpush3.bf16.msra.mxu0 %v4514_v4  ;;  %v1692_v38 = vor.u32 %v1691_v30, %v5818_v23  ;;  %v189_v44 = vor.u32 %v5820_v28, %v185_v22  ;;  %v1704_v45 = vrot.slane %v1702_v35, 1  ;;  %v5813_v49 = vshll.u32 %v4870_v42, 16  ;;  %v4885_v50 = vld [vmem:[%s5804_s1 + $0x18] sm:$0xff]   ;;  %v4902_v60 = vld [vmem:[%s5803_s0 + $0x20] sm:$0xff]   ;;  %v4536_v3 = vld [vmem:[%s5805_s2 + $0x8] sm:$0xff]  }
  0x30   :  { %4025 = vmatpush3.bf16.msra.mxu1 %v4515_v5  ;;  %3826 = vmatprep.subr.bf16.mxu0 %v4516_v6  ;;  %v186_v37 = vsel %vm174_vm0, %v181_v29, %v185_v22  ;;  %v1700_v48 = vor.u32 %v5816_v34, %v1696_v33  ;;  %v4887_v51 = vrot.slane %v1702_v35, 2  ;;  %v197_v52 = vor.u32 %v195_v47, %v193_v39  ;;  %v4908_v62 = vld [vmem:[%s5804_s1 + $0x20] sm:$0xff]   ;;  %v4946_v29 = vld [vmem:[%s5804_s1 + $0x28] sm:$0xff]   ;;  %v4560_v18 = vld [vmem:[%s5805_s2 + $0x170] sm:$0xff]  }
  0x31   :  { %4026 = vmatprep.subr.bf16.mxu1 %v4517_v7  ;;  %3836 = vmatprep.mubr.bf16.mxu0 %v186_v37  ;;  %v1697_v43 = vsel %vm174_vm0, %v1692_v38, %v1696_v33  ;;  %v1706_v53 = vshrl.u32 %v4840_v26, 16  ;;  %v201_v54 = vrot.slane %v5813_v49, 1  ;;  %v5811_v55 = vshll.u32 %v4885_v50, 16  ;;  %v4955_v33 = vld [vmem:[%s5803_s0 + $0x30] sm:$0xff]  }
  0x32   :  { %4036 = vmatprep.mubr.bf16.mxu1 %v1697_v43  ;;  %v194_v56 = vsel %vm174_vm0, %v189_v44, %v193_v39  ;;  %v4897_v58 = vrot.slane %v195_v47, 1  ;;  %v5814_v61 = vshrl.u32 %v4870_v42, 16  ;;  %v1705_v63 = vsel %vm174_vm0, %v1700_v48, %v1704_v45  ;;  %v4968_v43 = vld [vmem:[%s5804_s1 + $0x30] sm:$0xff]   ;;  %v4546_v47 = vld [vmem:[%s5805_s2 + $0x158] sm:$0xff]  }
  0x33   :  { %3827 = vmatpush3.bf16.msra.mxu0 %v4516_v6  ;;  %v1708_v59 = vor.u32 %v1706_v53, %v1704_v45  ;;  %v1712_v0 = vrot.slane %v5811_v55, 1  ;;  %v5812_v1 = vshrl.u32 %v4885_v50, 16  ;;  %v202_v2 = vsel %vm174_vm0, %v197_v52, %v201_v54 }
  0x34   :  { %4027 = vmatpush3.bf16.msra.mxu1 %v4517_v7  ;;  %3828 = vmatprep.subr.bf16.mxu0 %v4518_v8  ;;  %v4918_v4 = vrot.slane %v1706_v53, 1  ;;  %v207_v5 = vshll.u32 %v4902_v60, 16  ;;  %v1718_v6 = vshll.u32 %v4908_v62, 16  ;;  %v205_v7 = vor.u32 %v5814_v61, %v201_v54  ;;  %v4547_v54 = vld [vmem:[%s5805_s2 + $0x18] sm:$0xff]  }
  0x35   :  { %4028 = vmatprep.subr.bf16.mxu1 %v4519_v9  ;;  %v211_v21 = vshrl.u32 %v4902_v60, 16  ;;  %v1716_v22 = vor.u32 %v5812_v1, %v1712_v0  ;;  %v1722_v30 = vshrl.u32 %v4908_v62, 16  ;;  %v1730_v44 = vshrl.u32 %v4946_v29, 16 }
  0x36   :  { %v1734_v53 = vshll.u32 %v4968_v43, 16 }
  0x37   :  { %3829 = vmatpush3.bf16.msra.mxu0 %v4518_v8  ;;  %v4541_v8 = vld [vmem:[%s5805_s2 + $0x10] sm:$0xff]  }
  0x38   :  { %4029 = vmatpush3.bf16.msra.mxu1 %v4519_v9  ;;  %3830 = vmatprep.subr.bf16.mxu0 %v4520_v10  ;;  %v1713_v9 = vsel %vm174_vm0, %v1708_v59, %v1712_v0  ;;  %v227_v59 = vshrl.u32 %v4955_v33, 16 }
  0x39   :  { %4030 = vmatprep.subr.bf16.mxu1 %v4521_v11 }
  0x3b   :  { %3831 = vmatpush3.bf16.msra.mxu0 %v4520_v10  ;;  %v209_v10 = vrot.slane %v207_v5, 1 }
  0x3c   :  { %4031 = vmatpush3.bf16.msra.mxu1 %v4521_v11  ;;  %3832 = vmatprep.subr.bf16.mxu0 %v4522_v14  ;;  %v1720_v11 = vrot.slane %v1718_v6, 1 }
  0x3d   :  { %4032 = vmatprep.subr.bf16.mxu1 %v4523_v15  ;;  %v213_v31 = vor.u32 %v211_v21, %v209_v10  ;;  %v210_v38 = vsel %vm174_vm0, %v205_v7, %v209_v10  ;;  %v1738_v10 = vshrl.u32 %v4968_v43, 16 }
  0x3e   :  { %v1724_v35 = vor.u32 %v1722_v30, %v1720_v11  ;;  %v1721_v45 = vsel %vm174_vm0, %v1716_v22, %v1720_v11  ;;  %v5009_v11 = vor.u32 %v4862_v40, %v4897_v58 }
  0x3f   :  { %3833 = vmatpush3.bf16.msra.mxu0 %v4522_v14  ;;  %v4540_v14 = vld [vmem:[%s5805_s2 + $0x150] sm:$0xff]  }
  0x40   :  { %4033 = vmatpush3.bf16.msra.mxu1 %v4523_v15  ;;  %3834 = vmatprep.subr.bf16.mxu0 %v4524_v32  ;;  %v4938_v15 = vld [vmem:[%s5803_s0 + $0x28] sm:$0xff]  }
  0x41   :  { %4034 = vmatprep.subr.bf16.mxu1 %v4525_v36  ;;  %v219_v37 = vshrl.u32 %v4938_v15, 16 }
  0x43   :  { %3835 = vmatpush3.bf16.msra.mxu0 %v4524_v32  ;;  %v215_v32 = vshll.u32 %v4938_v15, 16 }
  0x44   :  { %4035 = vmatpush3.bf16.msra.mxu1 %v4525_v36  ;;  %3860 = vmatprep.subr.bf16.mxu0 %v4533_v41  ;;  %v1726_v36 = vshll.u32 %v4946_v29, 16 }
  0x45   :  { %4060 = vmatprep.subr.bf16.mxu1 %v4532_v46  ;;  %v217_v39 = vrot.slane %v215_v32, 1 }
  0x46   :  { %3837 = vmatmul.mubr.bf16.vlgmr.msra.gmra.mrb[0].mxu0 %v194_v56  ;;  %v4987_v56 = vld [vmem:[%s5803_s0 + $0x38] sm:$0xff]  }
  0x47   :  { %4037 = vmatmul.mubr.bf16.vlgmr.msra.gmra.mrb[0].mxu1 %v1705_v63  ;;  %3861 = vmatpush3.bf16.msra.mxu0 %v4533_v41  ;;  %v223_v41 = vshll.u32 %v4955_v33, 16  ;;  %v218_v48 = vsel %vm174_vm0, %v213_v31, %v217_v39  ;;  %v4994_v63 = vld [vmem:[%s5804_s1 + $0x38] sm:$0xff]   ;;  %v221_v0 = vor.u32 %v219_v37, %v217_v39  ;;  %v231_v7 = vshll.u32 %v4987_v56, 16 }
  0x48   :  { %4061 = vmatpush3.bf16.msra.mxu1 %v4532_v46  ;;  %3840 = vmatprep.mubr.bf16.mxu0 %v202_v2  ;;  %v1728_v46 = vrot.slane %v1726_v36, 1  ;;  %v235_v31 = vshrl.u32 %v4987_v56, 16 }
  0x49   :  { %4062 = vmatprep.subr.bf16.mxu1 %v4534_v57  ;;  %3862 = vmatprep.subr.bf16.mxu0 %v4536_v3  ;;  %v225_v52 = vrot.slane %v223_v41, 1  ;;  %v233_v22 = vrot.slane %v231_v7, 1 }
  0x4a   :  { %4040 = vmatprep.mubr.bf16.mxu1 %v1713_v9  ;;  %v1732_v2 = vor.u32 %v1730_v44, %v1728_v46 }
  0x4b   :  { %3863 = vmatpush3.bf16.msra.mxu0 %v4536_v3  ;;  %v1736_v3 = vrot.slane %v1734_v53, 1  ;;  %v229_v9 = vor.u32 %v227_v59, %v225_v52  ;;  %v226_v39 = vsel %vm174_vm0, %v221_v0, %v225_v52  ;;  %v5042_v52 = vor.u32 %v4887_v51, %v4918_v4  ;;  %v4556_v4 = vld [vmem:[%s5805_s2 + $0x28] sm:$0xff]  }
  0x4c   :  { %4063 = vmatpush3.bf16.msra.mxu1 %v4534_v57  ;;  %3864 = vmatprep.subr.bf16.mxu0 %v4541_v8  ;;  %v1729_v57 = vsel %vm174_vm0, %v1724_v35, %v1728_v46  ;;  %v5022_v35 = vld [vmem:[%s5804_s1 + $0x40] sm:$0xff]  }
  0x4d   :  { %4064 = vmatprep.subr.bf16.mxu1 %v4540_v14  ;;  %v1740_v40 = vor.u32 %v1738_v10, %v1736_v3  ;;  %v5832_v46 = vshll.u32 %v5022_v35, 16  ;;  %v1737_v55 = vsel %vm174_vm0, %v1732_v2, %v1736_v3  ;;  %v234_v1 = vsel %vm174_vm0, %v229_v9, %v233_v22  ;;  %v5055_v2 = vld [vmem:[%s5803_s0 + $0x48] sm:$0xff]  }
  0x4e   :  { %3841 = vmatmul.mubr.bf16.gmra.mrb[4].mxu0 %v210_v38  ;;  %v1746_v38 = vshrl.u32 %v4994_v63, 16  ;;  %v237_v3 = vor.u32 %v235_v31, %v233_v22  ;;  %v5825_v9 = vshll.u32 %v5055_v2, 16 }
  0x4f   :  { %4041 = vmatmul.mubr.bf16.gmra.mrb[4].mxu1 %v1721_v45  ;;  %3865 = vmatpush3.bf16.msra.mxu0 %v4541_v8  ;;  %v1742_v8 = vshll.u32 %v4994_v63, 16  ;;  %v1752_v49 = vrot.slane %v5832_v46, 1 }
  0x50   :  { %4065 = vmatpush3.bf16.msra.mxu1 %v4540_v14  ;;  %3844 = vmatprep.mubr.bf16.mxu0 %v218_v48  ;;  %v5016_v14 = vld [vmem:[%s5803_s0 + $0x40] sm:$0xff]   ;;  %v249_v22 = vrot.slane %v5825_v9, 1 }
  0x51   :  { %4044 = vmatprep.mubr.bf16.mxu1 %v1729_v57  ;;  %4066 = vmatprep.subr.bf16.mxu1 %v4546_v47  ;;  %v1744_v58 = vrot.slane %v1742_v8, 1  ;;  %v239_v45 = vshll.u32 %v5016_v14, 16  ;;  %v4552_v48 = vld [vmem:[%s5805_s2 + $0x160] sm:$0xff]   ;;  %v243_v51 = vshrl.u32 %v5016_v14, 16 }
  0x52   :  { %3866 = vmatprep.subr.bf16.mxu0 %v4547_v54  ;;  %v4553_v57 = vld [vmem:[%s5805_s2 + $0x20] sm:$0xff]  }
  0x53   :  { %3867 = vmatpush3.bf16.msra.mxu0 %v4547_v54  ;;  %v1745_v54 = vsel %vm174_vm0, %v1740_v40, %v1744_v58  ;;  %v241_v0 = vrot.slane %v239_v45, 1  ;;  %v5067_v40 = vld [vmem:[%s5804_s1 + $0x48] sm:$0xff]  }
  0x54   :  { %4067 = vmatpush3.bf16.msra.mxu1 %v4546_v47  ;;  %3868 = vmatprep.subr.bf16.mxu0 %v4553_v57  ;;  %v4554_v47 = vld [vmem:[%s5805_s2 + $0x168] sm:$0xff]   ;;  %v5828_v23 = vshrl.u32 %v5067_v40, 16 }
  0x55   :  { %4068 = vmatprep.subr.bf16.mxu1 %v4552_v48  ;;  %v245_v61 = vor.u32 %v243_v51, %v241_v0  ;;  %v242_v34 = vsel %vm174_vm0, %v237_v3, %v241_v0  ;;  %v4561_v3 = vld [vmem:[%s5805_s2 + $0x30] sm:$0xff]  }
  0x56   :  { %3845 = vmatmul.mubr.bf16.gmra.mrb[8].mxu0 %v226_v39  ;;  %v1748_v39 = vor.u32 %v1746_v38, %v1744_v58 }
  0x57   :  { %4045 = vmatmul.mubr.bf16.gmra.mrb[8].mxu1 %v1737_v55  ;;  %3848 = vmatprep.mubr.bf16.mxu0 %v234_v1  ;;  %v5833_v55 = vshrl.u32 %v5022_v35, 16  ;;  %v5077_v1 = vld [vmem:[%s5803_s0 + $0x50] sm:$0xff]   ;;  %v250_v17 = vsel %vm174_vm0, %v245_v61, %v249_v22 }
  0x58   :  { %4048 = vmatprep.mubr.bf16.mxu1 %v1745_v54  ;;  %4069 = vmatpush3.bf16.msra.mxu1 %v4552_v48  ;;  %v5823_v54 = vshll.u32 %v5067_v40, 16  ;;  %v5831_v48 = vshrl.u32 %v5055_v2, 16  ;;  %v5824_v27 = vshll.u32 %v5077_v1, 16  ;;  %v1753_v28 = vsel %vm174_vm0, %v1748_v39, %v1752_v49 }
  0x59   :  { %3869 = vmatpush3.bf16.msra.mxu0 %v4553_v57  ;;  %4070 = vmatprep.subr.bf16.mxu1 %v4554_v47  ;;  %v1756_v58 = vor.u32 %v5833_v55, %v1752_v49  ;;  %v5092_v57 = vld [vmem:[%s5804_s1 + $0x50] sm:$0xff]   ;;  %v5110_v49 = vld [vmem:[%s5803_s0 + $0x58] sm:$0xff]   ;;  %v5827_v61 = vshrl.u32 %v5077_v1, 16 }
  0x5a   :  { %3870 = vmatprep.subr.bf16.mxu0 %v4556_v4  ;;  %v1760_v24 = vrot.slane %v5823_v54, 1  ;;  %v257_v0 = vrot.slane %v5824_v27, 1  ;;  %v5826_v54 = vshll.u32 %v5092_v57, 16 }
  0x5c   :  { %4071 = vmatpush3.bf16.msra.mxu1 %v4554_v47  ;;  %v1761_v16 = vsel %vm174_vm0, %v1756_v58, %v1760_v24  ;;  %v5116_v47 = vld [vmem:[%s5804_s1 + $0x58] sm:$0xff]   ;;  %v1768_v39 = vrot.slane %v5826_v54, 1  ;;  %v5829_v58 = vshll.u32 %v5110_v49, 16  ;;  %v1764_v27 = vor.u32 %v5828_v23, %v1760_v24 }
  0x5d   :  { %3871 = vmatpush3.bf16.msra.mxu0 %v4556_v4  ;;  %4072 = vmatprep.subr.bf16.mxu1 %v4560_v18  ;;  %v253_v4 = vor.u32 %v5831_v48, %v249_v22  ;;  %v261_v9 = vor.u32 %v5827_v61, %v257_v0  ;;  %v267_v22 = vshrl.u32 %v5110_v49, 16  ;;  %v4566_v54 = vld [vmem:[%s5805_s2 + $0x178] sm:$0xff]  }
  0x5e   :  { %3849 = vmatmul.mubr.bf16.gmra.mrb[12].mxu0 %v242_v34  ;;  %3872 = vmatprep.subr.bf16.mxu0 %v4561_v3  ;;  %v5830_v34 = vshrl.u32 %v5092_v57, 16  ;;  %v1769_v48 = vsel %vm174_vm0, %v1764_v27, %v1768_v39 }
  0x5f   :  { %4049 = vmatmul.mubr.bf16.gmra.mrb[12].mxu1 %v1753_v28  ;;  %3852 = vmatprep.mubr.bf16.mxu0 %v250_v17  ;;  %v5834_v17 = vshll.u32 %v5116_v47, 16  ;;  %v5132_v28 = vld [vmem:[%s5803_s0 + $0x60] ss:$0 sps:$4 sm:$0xff]   ;;  %v258_v23 = vsel %vm174_vm0, %v253_v4, %v257_v0 }
  0x60   :  { %4052 = vmatprep.mubr.bf16.mxu1 %v1761_v16  ;;  %4073 = vmatpush3.bf16.msra.mxu1 %v4560_v18  ;;  %v265_v16 = vrot.slane %v5829_v58, 1  ;;  %v1772_v24 = vor.u32 %v5830_v34, %v1768_v39  ;;  %v5142_v18 = vld [vmem:[%s5804_s1 + $0x60] ss:$0 sps:$4 sm:$0xff]   ;;  %v271_v58 = vshll.u32 %v5132_v28, 16  ;;  %v4567_v34 = vld [vmem:[%s5805_s2 + $0x38] sm:$0xff]  }
  0x61   :  { %3873 = vmatpush3.bf16.msra.mxu0 %v4561_v3  ;;  %v1776_v61 = vrot.slane %v5834_v17, 1  ;;  %v1778_v3 = vshrl.u32 %v5116_v47, 16  ;;  %4074 = vmatprep.subr.bf16.mxu1 %v4566_v54  ;;  %v1782_v55 = vshll.u32 %v5142_v18, 16  ;;  %v4568_v17 = vld [vmem:[%s5805_s2 + $0x1c0] sm:$0xff]  }
  0x62   :  { %v266_v46 = vsel %vm174_vm0, %v261_v9, %v265_v16  ;;  %3874 = vmatprep.subr.bf16.mxu0 %v4567_v34  ;;  %v4569_v4 = vld [vmem:[%s5805_s2 + $0x80] sm:$0xff]   ;;  %v269_v27 = vor.u32 %v267_v22, %v265_v16  ;;  %v273_v9 = vrot.slane %v271_v58, 1  ;;  %v4572_v16 = vld [vmem:[%s5805_s2 + $0x1d0] sm:$0xff]  }
  0x63   :  { %v1777_v0 = vsel %vm174_vm0, %v1772_v24, %v1776_v61  ;;  %v1784_v39 = vrot.slane %v1782_v55, 1  ;;  %v4576_v24 = vld [vmem:[%s5805_s2 + $0x1e0] sm:$0xff]  }
  0x64   :  { %4075 = vmatpush3.bf16.msra.mxu1 %v4566_v54  ;;  %v1780_v54 = vor.u32 %v1778_v3, %v1776_v61  ;;  %v4571_v61 = vld [vmem:[%s5805_s2 + $0x88] sm:$0xff]  }
  0x65   :  { %4100 = vmatprep.subr.bf16.mxu1 %v4568_v17  ;;  %3875 = vmatpush3.bf16.msra.mxu0 %v4567_v34  ;;  %v4573_v34 = vld [vmem:[%s5805_s2 + $0x90] sm:$0xff]  }
  0x66   :  { %3853 = vmatmul.mubr.bf16.gmra.mrb[16].mxu0 %v258_v23  ;;  %3900 = vmatprep.subr.bf16.mxu0 %v4569_v4  ;;  %v274_v23 = vsel %vm174_vm0, %v269_v27, %v273_v9  ;;  %v671_v27 = vrot.slane %v4800_v12, 1  ;;  %v672_v9 = vrot.slane %v4805_v13, 1 }
  0x67   :  { %4053 = vmatmul.mubr.bf16.gmra.mrb[16].mxu1 %v1769_v48  ;;  %3856 = vmatprep.mubr.bf16.mxu0 %v266_v46  ;;  %v1785_v48 = vsel %vm174_vm0, %v1780_v54, %v1784_v39  ;;  %v4570_v46 = vld [vmem:[%s5805_s2 + $0x1c8] sm:$0xff]   ;;  %v4580_v54 = vld [vmem:[%s5805_s2 + $0x1f0] sm:$0xff]  }
  0x68   :  { %4056 = vmatprep.mubr.bf16.mxu1 %v1777_v0  ;;  %v4578_v0 = vld [vmem:[%s5805_s2 + $0x1e8] sm:$0xff]   ;;  %v4581_v39 = vld [vmem:[%s5805_s2 + $0xb0] sm:$0xff]  }
  0x6e   :  { %3857 = vmatmul.mubr.bf16.gmra.mrb[20].mxu0 %v274_v23  ;;  %v2181_v23 = vrot.slane %v4819_v19, 1 }
  0x6f   :  { %4057 = vmatmul.mubr.bf16.gmra.mrb[20].mxu1 %v1785_v48  ;;  %3876 = vmatprep.mubr.bf16.mxu0 %v4800_v12  ;;  %v2182_v48 = vrot.slane %v4824_v20, 1 }
  0x70   :  { %4076 = vmatprep.mubr.bf16.mxu1 %v4819_v19 }
  0x76   :  { %3877 = vmatmul.mubr.bf16.vlgmr.msra.gmra.mrb[0].mxu0 %v4805_v13 }
  0x77   :  { %4077 = vmatmul.mubr.bf16.vlgmr.msra.gmra.mrb[0].mxu1 %v4824_v20  ;;  %3901 = vmatpush3.bf16.msra.mxu0 %v4569_v4  ;;  %v4579_v4 = vld [vmem:[%s5805_s2 + $0xa8] sm:$0xff]  }
  0x78   :  { %4101 = vmatpush3.bf16.msra.mxu1 %v4568_v17  ;;  %3880 = vmatprep.mubr.bf16.mxu0 %v4835_v25  ;;  %v4574_v25 = vld [vmem:[%s5805_s2 + $0x1d8] sm:$0xff]  }
  0x79   :  { %4102 = vmatprep.subr.bf16.mxu1 %v4570_v46  ;;  %3902 = vmatprep.subr.bf16.mxu0 %v4571_v61  ;;  %v4575_v17 = vld [vmem:[%s5805_s2 + $0x98] sm:$0xff]  }
  0x7a   :  { %4080 = vmatprep.mubr.bf16.mxu1 %v4840_v26  ;;  %v4577_v26 = vld [vmem:[%s5805_s2 + $0xa0] sm:$0xff]  }
  0x7b   :  { %3903 = vmatpush3.bf16.msra.mxu0 %v4571_v61  ;;  %v943_v61 = vrot.slane %v207_v5, 2  ;;  %v2455_v5 = vrot.slane %v1730_v44, 1 }
  0x7c   :  { %4103 = vmatpush3.bf16.msra.mxu1 %v4570_v46  ;;  %3904 = vmatprep.subr.bf16.mxu0 %v4573_v34  ;;  %v942_v46 = vrot.slane %v211_v21, 1  ;;  %v947_v21 = vrot.slane %v215_v32, 2  ;;  %v951_v32 = vrot.slane %v223_v41, 2 }
  0x7d   :  { %4104 = vmatprep.subr.bf16.mxu1 %v4572_v16 }
  0x7e   :  { %3881 = vmatmul.mubr.bf16.gmra.mrb[4].mxu0 %v4870_v42 }
  0x7f   :  { %4081 = vmatmul.mubr.bf16.gmra.mrb[4].mxu1 %v4885_v50  ;;  %3905 = vmatpush3.bf16.msra.mxu0 %v4573_v34  ;;  %v2451_v34 = vrot.slane %v1722_v30, 1  ;;  %v4583_v30 = vld [vmem:[%s5805_s2 + $0xb8] sm:$0xff]  }
  0x80   :  { %4105 = vmatpush3.bf16.msra.mxu1 %v4572_v16  ;;  %3884 = vmatprep.mubr.bf16.mxu0 %v4902_v60  ;;  %v2452_v16 = vrot.slane %v1718_v6, 2  ;;  %v2456_v6 = vrot.slane %v1726_v36, 2  ;;  %v2459_v36 = vrot.slane %v1738_v10, 1 }
  0x81   :  { %4084 = vmatprep.mubr.bf16.mxu1 %v4908_v62  ;;  %4106 = vmatprep.subr.bf16.mxu1 %v4574_v25 }
  0x82   :  { %3906 = vmatprep.subr.bf16.mxu0 %v4575_v17  ;;  %v5258_v44 = vor.u32 %v2452_v16, %v2451_v34  ;;  %v2463_v34 = vrot.slane %v1746_v38, 1  ;;  %v2464_v16 = vrot.slane %v1742_v8, 2  ;;  %v958_v8 = vrot.slane %v243_v51, 1 }
  0x83   :  { %3907 = vmatpush3.bf16.msra.mxu0 %v4575_v17  ;;  %v946_v17 = vrot.slane %v219_v37, 1  ;;  %v950_v37 = vrot.slane %v227_v59, 1  ;;  %v5837_v51 = vshrl.u32 %v5055_v2, 16 }
  0x84   :  { %4107 = vmatpush3.bf16.msra.mxu1 %v4574_v25  ;;  %3908 = vmatprep.subr.bf16.mxu0 %v4577_v26  ;;  %v4582_v25 = vld [vmem:[%s5805_s2 + $0x1f8] sm:$0xff]  }
  0x85   :  { %4108 = vmatprep.subr.bf16.mxu1 %v4576_v24  ;;  %v952_v41 = vor.u32 %v951_v32, %v950_v37  ;;  %v5836_v37 = vshll.u32 %v5022_v35, 16 }
  0x86   :  { %3885 = vmatmul.mubr.bf16.gmra.mrb[8].mxu0 %v4938_v15 }
  0x87   :  { %4085 = vmatmul.mubr.bf16.gmra.mrb[8].mxu1 %v4946_v29  ;;  %3888 = vmatprep.mubr.bf16.mxu0 %v4955_v33  ;;  %v2468_v32 = vrot.slane %v5836_v37, 2 }
  0x88   :  { %4088 = vmatprep.mubr.bf16.mxu1 %v4968_v43  ;;  %4109 = vmatpush3.bf16.msra.mxu1 %v4576_v24  ;;  %v948_v24 = vor.u32 %v947_v21, %v946_v17  ;;  %v2465_v21 = vor.u32 %v2464_v16, %v2463_v34  ;;  %v5839_v34 = vshrl.u32 %v5067_v40, 16 }
  0x89   :  { %3909 = vmatpush3.bf16.msra.mxu0 %v4577_v26  ;;  %4110 = vmatprep.subr.bf16.mxu1 %v4578_v0  ;;  %v5251_v26 = vor.u32 %v943_v61, %v942_v46  ;;  %v954_v46 = vrot.slane %v235_v31, 1  ;;  %v955_v61 = vrot.slane %v231_v7, 2  ;;  %v5286_v7 = vld [vmem:[%s5805_s2 + $0x200] sm:$0xff]  }
  0x8a   :  { %3910 = vmatprep.subr.bf16.mxu0 %v4579_v4  ;;  %v5291_v31 = vld [vmem:[%s5805_s2 + $0xc0] sm:$0xff]   ;;  %v2471_v16 = vrot.slane %v5839_v34, 1 }
  0x8b   :  { %v5268_v59 = vsel %vm926_vm1, %v5251_v26, %v948_v24  ;;  %v956_v38 = vor.u32 %v955_v61, %v954_v46 }
  0x8c   :  { %4111 = vmatpush3.bf16.msra.mxu1 %v4578_v0  ;;  %v2457_v0 = vor.u32 %v2456_v6, %v2455_v5  ;;  %v5835_v5 = vshrl.u32 %v5022_v35, 16 }
  0x8d   :  { %3911 = vmatpush3.bf16.msra.mxu0 %v4579_v4  ;;  %4112 = vmatprep.subr.bf16.mxu1 %v4580_v54  ;;  %v2460_v4 = vrot.slane %v1734_v53, 2 }
  0x8e   :  { %3889 = vmatmul.mubr.bf16.gmra.mrb[12].mxu0 %v4987_v56  ;;  %3912 = vmatprep.subr.bf16.mxu0 %v4581_v39  ;;  %v5277_v53 = vsel %vm926_vm1, %v5258_v44, %v2457_v0  ;;  %v2467_v6 = vrot.slane %v5835_v5, 1  ;;  %v5840_v5 = vshll.u32 %v5067_v40, 16 }
  0x8f   :  { %4089 = vmatmul.mubr.bf16.gmra.mrb[12].mxu1 %v4994_v63  ;;  %3892 = vmatprep.mubr.bf16.mxu0 %v5016_v14  ;;  %v2461_v10 = vor.u32 %v2460_v4, %v2459_v36  ;;  %v962_v4 = vrot.slane %v5837_v51, 1 }
  0x90   :  { %4092 = vmatprep.mubr.bf16.mxu1 %v5022_v35  ;;  %4113 = vmatpush3.bf16.msra.mxu1 %v4580_v54  ;;  %v5294_v54 = vsel %vm926_vm1, %v948_v24, %v952_v41  ;;  %v5308_v24 = vsel %vm926_vm1, %v952_v41, %v956_v38  ;;  %v2469_v61 = vor.u32 %v2468_v32, %v2467_v6  ;;  %v2472_v37 = vrot.slane %v5840_v5, 2 }
  0x91   :  { %3913 = vmatpush3.bf16.msra.mxu0 %v4581_v39  ;;  %4114 = vmatprep.subr.bf16.mxu1 %v4582_v25  ;;  %v959_v39 = vrot.slane %v239_v45, 2  ;;  %v5301_v17 = vsel %vm926_vm1, %v2457_v0, %v2461_v10  ;;  %v5838_v45 = vshll.u32 %v5055_v2, 16  ;;  %v5315_v0 = vsel %vm926_vm1, %v2461_v10, %v2465_v21 }
  0x92   :  { %3914 = vmatprep.subr.bf16.mxu0 %v4583_v30  ;;  %v5842_v10 = vshll.u32 %v5077_v1, 16  ;;  %v5332_v6 = vsel %vm926_vm1, %v2465_v21, %v2469_v61  ;;  %v5843_v32 = vshrl.u32 %v5092_v57, 16  ;;  %v970_v5 = vrot.slane %v267_v22, 1 }
  0x93   :  { %v960_v36 = vor.u32 %v959_v39, %v958_v8  ;;  %v963_v46 = vrot.slane %v5838_v45, 2  ;;  %v5841_v39 = vshrl.u32 %v5077_v1, 16  ;;  %v5845_v21 = vshll.u32 %v5110_v49, 16 }
  0x94   :  { %4115 = vmatpush3.bf16.msra.mxu1 %v4582_v25  ;;  %v967_v51 = vrot.slane %v5842_v10, 2  ;;  %v2475_v45 = vrot.slane %v5843_v32, 1  ;;  %v2479_v10 = vrot.slane %v1778_v3, 1  ;;  %v5846_v32 = vshll.u32 %v5116_v47, 16 }
  0x95   :  { %3915 = vmatpush3.bf16.msra.mxu0 %v4583_v30  ;;  %4140 = vmatprep.subr.bf16.mxu1 %v5286_v7  ;;  %v5323_v41 = vsel %vm926_vm1, %v956_v38, %v960_v36  ;;  %v964_v8 = vor.u32 %v963_v46, %v962_v4  ;;  %v966_v25 = vrot.slane %v5841_v39, 1  ;;  %v2473_v30 = vor.u32 %v2472_v37, %v2471_v16 }
  0x96   :  { %3893 = vmatmul.mubr.bf16.gmra.mrb[16].mxu0 %v5055_v2  ;;  %3940 = vmatprep.subr.bf16.mxu0 %v5291_v31  ;;  %v5844_v38 = vshll.u32 %v5092_v57, 16  ;;  %v971_v16 = vrot.slane %v5845_v21, 2  ;;  %v974_v22 = vshrl.u32 %v5132_v28, 16  ;;  %v2486_v3 = vrot.slane %v1782_v55, 2 }
  0x97   :  { %4093 = vmatmul.mubr.bf16.gmra.mrb[16].mxu1 %v5067_v40  ;;  %3896 = vmatprep.mubr.bf16.mxu0 %v5077_v1  ;;  %v5341_v46 = vsel %vm926_vm1, %v960_v36, %v964_v8  ;;  %v968_v34 = vor.u32 %v967_v51, %v966_v25  ;;  %v5349_v37 = vsel %vm926_vm1, %v2469_v61, %v2473_v30  ;;  %v2480_v36 = vrot.slane %v5846_v32, 2 }
  0x98   :  { %v2476_v4 = vrot.slane %v5844_v38, 2  ;;  %4096 = vmatprep.mubr.bf16.mxu1 %v5092_v57  ;;  %v972_v51 = vor.u32 %v971_v16, %v970_v5  ;;  %v977_v38 = vrot.slane %v271_v58, 2  ;;  %v673_v5 = vsel %vm670_vm2, %v671_v27, %v672_v9  ;;  %v5388_v27 = vld [vmem:[%s5803_s0 + $0x10] sm:$0xff]  }
  0x99   :  { %v5356_v25 = vsel %vm926_vm1, %v964_v8, %v968_v34  ;;  %v2481_v61 = vor.u32 %v2480_v36, %v2479_v10  ;;  %v976_v8 = vrot.slane %v974_v22, 1  ;;  %v2183_v55 = vsel %vm670_vm2, %v2181_v23, %v2182_v48  ;;  %v5397_v23 = vld [vmem:[%s5804_s1 + $0x10] sm:$0xff]   ;;  %v5406_v22 = vld [vmem:[%s5803_s0 + $0x18] sm:$0xff]  }
  0x9a   :  { %v2477_v39 = vor.u32 %v2476_v4, %v2475_v45  ;;  %v2483_v45 = vshrl.u32 %v5142_v18, 16  ;;  %v5368_v4 = vsel %vm926_vm1, %v968_v34, %v972_v51  ;;  %v2184_v32 = vrot.slane %v5397_v23, 1 }
  0x9b   :  { %v978_v16 = vor.u32 %v977_v38, %v976_v8  ;;  %v676_v38 = vrot.slane %v5406_v22, 1  ;;  %v4586_v8 = vld [vmem:[%s5805_s2 + $0x208] sm:$0xff]  }
  0x9c   :  { %v5362_v21 = vsel %vm926_vm1, %v2473_v30, %v2477_v39  ;;  %v5376_v58 = vsel %vm926_vm1, %v2477_v39, %v2481_v61  ;;  %v2485_v30 = vrot.slane %v2483_v45, 1  ;;  %v674_v39 = vrot.slane %v5388_v27, 1  ;;  %v5415_v45 = vld [vmem:[%s5804_s1 + $0x18] sm:$0xff]  }
  0x9d   :  { %v5392_v10 = vsel %vm926_vm1, %v972_v51, %v978_v16  ;;  %v4589_v16 = vld [vmem:[%s5805_s2 + $0xd0] sm:$0xff]  }
  0x9e   :  { %3897 = vmatmul.mubr.bf16.gmra.mrb[20].mxu0 %v5110_v49  ;;  %v2487_v34 = vor.u32 %v2486_v3, %v2485_v30  ;;  %v675_v51 = vsel %vm670_vm2, %v672_v9, %v674_v39  ;;  %v2186_v3 = vrot.slane %v5415_v45, 1  ;;  %v4587_v9 = vld [vmem:[%s5805_s2 + $0xc8] sm:$0xff]  }
  0x9f   :  { %4097 = vmatmul.mubr.bf16.gmra.mrb[20].mxu1 %v5116_v47  ;;  %3916 = vmatprep.mubr.bf16.mxu0 %v673_v5  ;;  %v677_v5 = vsel %vm670_vm2, %v674_v39, %v676_v38 }
  0xa0   :  { %4116 = vmatprep.mubr.bf16.mxu1 %v2183_v55  ;;  %v5401_v36 = vsel %vm926_vm1, %v2481_v61, %v2487_v34  ;;  %v2185_v61 = vsel %vm670_vm2, %v2182_v48, %v2184_v32  ;;  %v2187_v30 = vsel %vm670_vm2, %v2184_v32, %v2186_v3  ;;  %v678_v55 = vrot.slane %v4902_v60, 1  ;;  %v4588_v34 = vld [vmem:[%s5805_s2 + $0x210] sm:$0xff]   ;;  %v4590_v32 = vld [vmem:[%s5805_s2 + $0x218] sm:$0xff]  }
  0xa1   :  { %v2188_v48 = vrot.slane %v4908_v62, 1  ;;  %v2190_v60 = vrot.slane %v4946_v29, 1  ;;  %v4591_v29 = vld [vmem:[%s5805_s2 + $0xd8] sm:$0xff]  }
  0xa3   :  { %v2189_v62 = vsel %vm670_vm2, %v2186_v3, %v2188_v48  ;;  %v684_v3 = vrot.slane %v4987_v56, 1 }
  0xa6   :  { %3917 = vmatmul.mubr.bf16.vlgmr.msra.gmra.mrb[0].mxu0 %v675_v51  ;;  %v2192_v51 = vrot.slane %v4968_v43, 1 }
  0xa7   :  { %4117 = vmatmul.mubr.bf16.vlgmr.msra.gmra.mrb[0].mxu1 %v2185_v61  ;;  %3941 = vmatpush3.bf16.msra.mxu0 %v5291_v31  ;;  %v680_v31 = vrot.slane %v4938_v15, 1  ;;  %v2191_v15 = vsel %vm670_vm2, %v2188_v48, %v2190_v60  ;;  %v4593_v61 = vld [vmem:[%s5805_s2 + $0xe0] sm:$0xff]   ;;  %v2196_v48 = vrot.slane %v5022_v35, 1 }
  0xa8   :  { %4141 = vmatpush3.bf16.msra.mxu1 %v5286_v7  ;;  %3920 = vmatprep.mubr.bf16.mxu0 %v677_v5  ;;  %v679_v7 = vsel %vm670_vm2, %v676_v38, %v678_v55  ;;  %v682_v38 = vrot.slane %v4955_v33, 1  ;;  %v4592_v5 = vld [vmem:[%s5805_s2 + $0x220] sm:$0xff]   ;;  %v2193_v43 = vsel %vm670_vm2, %v2190_v60, %v2192_v51  ;;  %v4597_v60 = vld [vmem:[%s5805_s2 + $0xf0] sm:$0xff]  }
  0xa9   :  { %4142 = vmatprep.subr.bf16.mxu1 %v4586_v8  ;;  %3942 = vmatprep.subr.bf16.mxu0 %v4587_v9  ;;  %v681_v39 = vsel %vm670_vm2, %v678_v55, %v680_v31  ;;  %v686_v55 = vrot.slane %v5016_v14, 1 }
  0xaa   :  { %4120 = vmatprep.mubr.bf16.mxu1 %v2187_v30  ;;  %v683_v33 = vsel %vm670_vm2, %v680_v31, %v682_v38  ;;  %v685_v56 = vsel %vm670_vm2, %v682_v38, %v684_v3  ;;  %v4595_v30 = vld [vmem:[%s5805_s2 + $0xe8] sm:$0xff]   ;;  %v4596_v31 = vld [vmem:[%s5805_s2 + $0x230] sm:$0xff]   ;;  %v4600_v38 = vld [vmem:[%s5805_s2 + $0x240] sm:$0xff]  }
  0xab   :  { %3943 = vmatpush3.bf16.msra.mxu0 %v4587_v9  ;;  %v687_v14 = vsel %vm670_vm2, %v684_v3, %v686_v55  ;;  %v5847_v3 = vshrl.u32 %v4800_v12, 16 }
  0xac   :  { %4143 = vmatpush3.bf16.msra.mxu1 %v4586_v8  ;;  %3944 = vmatprep.subr.bf16.mxu0 %v4589_v16  ;;  %v2194_v8 = vrot.slane %v4994_v63, 1  ;;  %v4594_v63 = vld [vmem:[%s5805_s2 + $0x228] sm:$0xff]  }
  0xad   :  { %4144 = vmatprep.subr.bf16.mxu1 %v4588_v34 }
  0xae   :  { %3921 = vmatmul.mubr.bf16.gmra.mrb[4].mxu0 %v679_v7  ;;  %v2195_v9 = vsel %vm670_vm2, %v2192_v51, %v2194_v8  ;;  %v2197_v35 = vsel %vm670_vm2, %v2194_v8, %v2196_v48  ;;  %v4601_v51 = vld [vmem:[%s5805_s2 + $0x100] sm:$0xff]   ;;  %v5848_v8 = vshll.u32 %v4800_v12, 16 }
  0xaf   :  { %4121 = vmatmul.mubr.bf16.gmra.mrb[4].mxu1 %v2189_v62  ;;  %3945 = vmatpush3.bf16.msra.mxu0 %v4589_v16  ;;  %v688_v16 = vrot.slane %v5055_v2, 1  ;;  %v4599_v62 = vld [vmem:[%s5805_s2 + $0xf8] sm:$0xff]  }
  0xb0   :  { %4145 = vmatpush3.bf16.msra.mxu1 %v4588_v34  ;;  %3924 = vmatprep.mubr.bf16.mxu0 %v681_v39  ;;  %v2198_v34 = vrot.slane %v5067_v40, 1  ;;  %v4598_v40 = vld [vmem:[%s5805_s2 + $0x238] sm:$0xff]   ;;  %v690_v39 = vrot.slane %v5077_v1, 1 }
  0xb1   :  { %4124 = vmatprep.mubr.bf16.mxu1 %v2191_v15  ;;  %4146 = vmatprep.subr.bf16.mxu1 %v4590_v32  ;;  %v689_v7 = vsel %vm670_vm2, %v686_v55, %v688_v16  ;;  %v692_v15 = vrot.slane %v5110_v49, 1  ;;  %v5852_v55 = vshll.u32 %v4819_v19, 16 }
  0xb2   :  { %3946 = vmatprep.subr.bf16.mxu0 %v4591_v29  ;;  %v2199_v2 = vsel %vm670_vm2, %v2196_v48, %v2198_v34  ;;  %v691_v1 = vsel %vm670_vm2, %v688_v16, %v690_v39  ;;  %v5853_v16 = vshrl.u32 %v4824_v20, 16 }
  0xb3   :  { %3947 = vmatpush3.bf16.msra.mxu0 %v4591_v29  ;;  %v2202_v29 = vrot.slane %v5116_v47, 1  ;;  %v693_v49 = vsel %vm670_vm2, %v690_v39, %v692_v15  ;;  %v2437_v48 = vrot.slane %v5852_v55, 2  ;;  %v5855_v39 = vshrl.u32 %v4870_v42, 16 }
  0xb4   :  { %4147 = vmatpush3.bf16.msra.mxu1 %v4590_v32  ;;  %3948 = vmatprep.subr.bf16.mxu0 %v4593_v61  ;;  %v2200_v32 = vrot.slane %v5092_v57, 1  ;;  %v1216_v55 = vrot.slane %v5406_v22, 2 }
  0xb5   :  { %4148 = vmatprep.subr.bf16.mxu1 %v4592_v5 }
  0xb6   :  { %3925 = vmatmul.mubr.bf16.gmra.mrb[8].mxu0 %v683_v33  ;;  %v2201_v57 = vsel %vm670_vm2, %v2198_v34, %v2200_v32  ;;  %v2203_v47 = vsel %vm670_vm2, %v2200_v32, %v2202_v29  ;;  %v5849_v33 = vshrl.u32 %v4805_v13, 16  ;;  %v2439_v34 = vrot.slane %v5853_v16, 1 }
  0xb7   :  { %4125 = vmatmul.mubr.bf16.gmra.mrb[8].mxu1 %v2193_v43  ;;  %3928 = vmatprep.mubr.bf16.mxu0 %v685_v56  ;;  %v5850_v56 = vshll.u32 %v4805_v13, 16  ;;  %v694_v13 = vrot.slane %v5132_v28, 1  ;;  %v938_v32 = vrot.slane %v5855_v39, 1  ;;  %v5856_v28 = vshll.u32 %v4870_v42, 16  ;;  %v4602_v42 = vld [vmem:[%s5805_s2 + $0x248] sm:$0xff]   ;;  %v4630_v39 = vld [vmem:[%s5803_s0 + $0x38] sm:$0xff]  }
  0xb8   :  { %4128 = vmatprep.mubr.bf16.mxu1 %v2195_v9  ;;  %4149 = vmatpush3.bf16.msra.mxu1 %v4592_v5  ;;  %v928_v5 = vrot.slane %v5848_v8, 2  ;;  %v930_v43 = vrot.slane %v5849_v33, 1  ;;  %v4605_v33 = vld [vmem:[%s5805_s2 + $0x110] sm:$0xff]  }
  0xb9   :  { %3949 = vmatpush3.bf16.msra.mxu0 %v4593_v61  ;;  %4150 = vmatprep.subr.bf16.mxu1 %v4594_v63  ;;  %v927_v61 = vrot.slane %v5847_v3, 1  ;;  %v931_v9 = vrot.slane %v5850_v56, 2  ;;  %v4612_v56 = vld [vmem:[%s5805_s2 + $0x270] sm:$0xff]  }
  0xba   :  { %3950 = vmatprep.subr.bf16.mxu0 %v4595_v30 }
  0xbc   :  { %4151 = vmatpush3.bf16.msra.mxu1 %v4594_v63  ;;  %v5851_v63 = vshrl.u32 %v4819_v19, 16 }
  0xbd   :  { %3951 = vmatpush3.bf16.msra.mxu0 %v4595_v30  ;;  %4152 = vmatprep.subr.bf16.mxu1 %v4596_v31 }
  0xbe   :  { %3929 = vmatmul.mubr.bf16.gmra.mrb[12].mxu0 %v687_v14  ;;  %3952 = vmatprep.subr.bf16.mxu0 %v4597_v60  ;;  %v2436_v30 = vrot.slane %v5851_v63, 1  ;;  %v929_v14 = vor.u32 %v928_v5, %v927_v61  ;;  %v1214_v63 = vrot.slane %v5388_v27, 2  ;;  %v4624_v27 = vld [vmem:[%s5803_s0 + $0x20] sm:$0xff]  }
  0xbf   :  { %4129 = vmatmul.mubr.bf16.gmra.mrb[12].mxu1 %v2197_v35  ;;  %3932 = vmatprep.mubr.bf16.mxu0 %v689_v7  ;;  %v932_v35 = vor.u32 %v931_v9, %v930_v43 }
  0xc0   :  { %4132 = vmatprep.mubr.bf16.mxu1 %v2199_v2  ;;  %4153 = vmatpush3.bf16.msra.mxu1 %v4596_v31  ;;  %v5854_v31 = vshll.u32 %v4824_v20, 16  ;;  %v2438_v19 = vor.u32 %v2437_v48, %v2436_v30  ;;  %v695_v2 = vsel %vm670_vm2, %v692_v15, %v694_v13  ;;  %v5858_v15 = vshll.u32 %v4885_v50, 16  ;;  %v4627_v13 = vld [vmem:[%s5804_s1 + $0x28] sm:$0xff]  }
  0xc1   :  { %3953 = vmatpush3.bf16.msra.mxu0 %v4597_v60  ;;  %4154 = vmatprep.subr.bf16.mxu1 %v4598_v40  ;;  %v2204_v60 = vrot.slane %v5142_v18, 1  ;;  %v933_v20 = vsel %vm926_vm1, %v929_v14, %v932_v35  ;;  %v5857_v18 = vshrl.u32 %v4885_v50, 16  ;;  %v4603_v50 = vld [vmem:[%s5805_s2 + $0x108] sm:$0xff]   ;;  %v2722_v30 = vrot.slane %v5397_v23, 2 }
  0xc2   :  { %3954 = vmatprep.subr.bf16.mxu0 %v4599_v62  ;;  %v2440_v12 = vrot.slane %v5854_v31, 2  ;;  %v2724_v48 = vrot.slane %v5415_v45, 2  ;;  %v1217_v31 = vsel %vm1210_vm3, %v1214_v63, %v1216_v55  ;;  %v1218_v23 = vrot.slane %v4624_v27, 2  ;;  %v4626_v45 = vld [vmem:[%s5803_s0 + $0x28] sm:$0xff]   ;;  %v3114_v27 = vld [vmem:[#allocation2 + $0x18] sm:$0xff] }
  0xc4   :  { %4155 = vmatpush3.bf16.msra.mxu1 %v4598_v40  ;;  %v2441_v7 = vor.u32 %v2440_v12, %v2439_v34  ;;  %v2205_v40 = vsel %vm670_vm2, %v2202_v29, %v2204_v60  ;;  %v1220_v12 = vrot.slane %v4626_v45, 2  ;;  %v2728_v60 = vrot.slane %v4627_v13, 2  ;;  %v3116_v13 = vld [vmem:[#allocation2 + $0x28] sm:$0xff] }
  0xc5   :  { %3955 = vmatpush3.bf16.msra.mxu0 %v4599_v62  ;;  %4180 = vmatprep.subr.bf16.mxu1 %v4600_v38  ;;  %v1219_v14 = vsel %vm1210_vm3, %v1216_v55, %v1218_v23  ;;  %v3112_v55 = vld [vmem:[#allocation2 + $0x8] sm:$0xff] }
  0xc6   :  { %3933 = vmatmul.mubr.bf16.gmra.mrb[16].mxu0 %v691_v1  ;;  %3980 = vmatprep.subr.bf16.mxu0 %v4601_v51  ;;  %v2442_v62 = vsel %vm926_vm1, %v2438_v19, %v2441_v7  ;;  %v939_v1 = vrot.slane %v5856_v28, 2  ;;  %v2446_v61 = vsel %vm926_vm1, %v2441_v7, %v5042_v52  ;;  %v1221_v19 = vsel %vm1210_vm3, %v1218_v23, %v1220_v12  ;;  %v4631_v28 = vld [vmem:[%s5804_s1 + $0x38] sm:$0xff]  }
  0xc7   :  { %4133 = vmatmul.mubr.bf16.gmra.mrb[16].mxu1 %v2201_v57  ;;  %3936 = vmatprep.mubr.bf16.mxu0 %v693_v49  ;;  %v2447_v57 = vrot.slane %v5857_v18, 1  ;;  %v2448_v49 = vrot.slane %v5858_v15, 2 }
  0xc8   :  { %4136 = vmatprep.mubr.bf16.mxu1 %v2203_v47  ;;  %v940_v29 = vor.u32 %v939_v1, %v938_v32  ;;  %v937_v47 = vsel %vm926_vm1, %v932_v35, %v5009_v11  ;;  %v1224_v32 = vrot.slane %v4630_v39, 2  ;;  %v2732_v1 = vrot.slane %v4631_v28, 2  ;;  %v3120_v28 = vld [vmem:[#allocation2 + $0x48] sm:$0xff] }
  0xc9   :  { %v2449_v3 = vor.u32 %v2448_v49, %v2447_v57 }
  0xca   :  { %v941_v8 = vsel %vm926_vm1, %v5009_v11, %v940_v29  ;;  %v4604_v11 = vld [vmem:[%s5805_s2 + $0x250] sm:$0xff]   ;;  %v945_v43 = vsel %vm926_vm1, %v940_v29, %v5251_v26  ;;  %v4609_v26 = vld [vmem:[%s5805_s2 + $0x120] sm:$0xff]  }
  0xcb   :  { %v2450_v5 = vsel %vm926_vm1, %v5042_v52, %v2449_v3  ;;  %v2454_v52 = vsel %vm926_vm1, %v2449_v3, %v5258_v44  ;;  %v4608_v44 = vld [vmem:[%s5805_s2 + $0x260] sm:$0xff]  }
  0xcc   :  { %v4632_v29 = vld [vmem:[%s5803_s0 + $0x40] sm:$0xff]  }
  0xcd   :  { %v4633_v3 = vld [vmem:[%s5804_s1 + $0x40] sm:$0xff]  }
  0xce   :  { %3937 = vmatmul.mubr.bf16.gmra.mrb[20].mxu0 %v695_v2  ;;  %v4628_v2 = vld [vmem:[%s5803_s0 + $0x30] sm:$0xff]  }
  0xcf   :  { %4137 = vmatmul.mubr.bf16.gmra.mrb[20].mxu1 %v2205_v40  ;;  %3956 = vmatprep.mubr.bf16.mxu0 %v933_v20  ;;  %v1222_v40 = vrot.slane %v4628_v2, 2  ;;  %v4629_v20 = vld [vmem:[%s5804_s1 + $0x30] sm:$0xff]   ;;  %v3118_v2 = vld [vmem:[#allocation2 + $0x38] sm:$0xff] }
  0xd0   :  { %4156 = vmatprep.mubr.bf16.mxu1 %v2442_v62  ;;  %v2730_v62 = vrot.slane %v4629_v20, 2  ;;  %v3135_v20 = vld [vmem:[#allocation2 + $0xc0] sm:$0xff] }
  0xd1   :  { %v1223_v18 = vsel %vm1210_vm3, %v1220_v12, %v1222_v40  ;;  %v1225_v15 = vsel %vm1210_vm3, %v1222_v40, %v1224_v32  ;;  %v3115_v12 = vld [vmem:[#allocation2 + $0x20] sm:$0xff] }
  0xd2   :  { %v2731_v57 = vsel %vm1210_vm3, %v2728_v60, %v2730_v62  ;;  %v2733_v49 = vsel %vm1210_vm3, %v2730_v62, %v2732_v1  ;;  %v3136_v62 = vld [vmem:[#allocation2 + $0xc8] sm:$0xff] }
  0xd3   :  { %v4271_v39 = vpack.c.bf16 %v3136_v62, %v3135_v20 }
  0xd6   :  { %3957 = vmatmul.mubr.bf16.vlgmr.msra.gmra.mrb[0].mxu0 %v937_v47  ;;  %v1226_v47 = vrot.slane %v4632_v29, 2  ;;  %v3122_v29 = vld [vmem:[#allocation2 + $0x58] sm:$0xff] }
  0xd7   :  { %4157 = vmatmul.mubr.bf16.vlgmr.msra.gmra.mrb[0].mxu1 %v2446_v61  ;;  %3981 = vmatpush3.bf16.msra.mxu0 %v4601_v51  ;;  %v4607_v51 = vld [vmem:[%s5805_s2 + $0x118] sm:$0xff]   ;;  %v2734_v61 = vrot.slane %v4633_v3, 2  ;;  %v3139_v3 = vld [vmem:[#allocation2 + $0xe0] sm:$0xff] }
  0xd8   :  { %4181 = vmatpush3.bf16.msra.mxu1 %v4600_v38  ;;  %3960 = vmatprep.mubr.bf16.mxu0 %v941_v8  ;;  %v4606_v38 = vld [vmem:[%s5805_s2 + $0x258] sm:$0xff]  }
  0xd9   :  { %4182 = vmatprep.subr.bf16.mxu1 %v4602_v42  ;;  %3982 = vmatprep.subr.bf16.mxu0 %v4603_v50 }
  0xda   :  { %4160 = vmatprep.mubr.bf16.mxu1 %v2450_v5 }
  0xdb   :  { %3983 = vmatpush3.bf16.msra.mxu0 %v4603_v50  ;;  %v4635_v50 = vld [vmem:[%s5804_s1 + $0x48] sm:$0xff]  }
  0xdc   :  { %4183 = vmatpush3.bf16.msra.mxu1 %v4602_v42  ;;  %3984 = vmatprep.subr.bf16.mxu0 %v4605_v33  ;;  %v4634_v42 = vld [vmem:[%s5803_s0 + $0x48] sm:$0xff]   ;;  %v2736_v5 = vrot.slane %v4635_v50, 2 }
  0xdd   :  { %4184 = vmatprep.subr.bf16.mxu1 %v4604_v11  ;;  %v1228_v8 = vrot.slane %v4634_v42, 2  ;;  %v3124_v50 = vld [vmem:[#allocation2 + $0x68] sm:$0xff] }
  0xde   :  { %3961 = vmatmul.mubr.bf16.gmra.mrb[4].mxu0 %v945_v43 }
  0xdf   :  { %4161 = vmatmul.mubr.bf16.gmra.mrb[4].mxu1 %v2454_v52  ;;  %3985 = vmatpush3.bf16.msra.mxu0 %v4605_v33  ;;  %v1227_v33 = vsel %vm1210_vm3, %v1224_v32, %v1226_v47  ;;  %v1229_v43 = vsel %vm1210_vm3, %v1226_v47, %v1228_v8  ;;  %v2737_v52 = vsel %vm1210_vm3, %v2734_v61, %v2736_v5  ;;  %v3119_v32 = vld [vmem:[#allocation2 + $0x40] sm:$0xff] }
  0xe0   :  { %4185 = vmatpush3.bf16.msra.mxu1 %v4604_v11  ;;  %3964 = vmatprep.mubr.bf16.mxu0 %v5268_v59  ;;  %v4610_v59 = vld [vmem:[%s5805_s2 + $0x268] sm:$0xff]   ;;  %v2735_v11 = vsel %vm1210_vm3, %v2732_v1, %v2734_v61  ;;  %v4273_v1 = vpack.c.bf16 %v3120_v28, %v3119_v32 }
  0xe1   :  { %4164 = vmatprep.mubr.bf16.mxu1 %v5277_v53  ;;  %4186 = vmatprep.subr.bf16.mxu1 %v4606_v38  ;;  %v4611_v53 = vld [vmem:[%s5805_s2 + $0x128] sm:$0xff]  }
  0xe2   :  { %3986 = vmatprep.subr.bf16.mxu0 %v4607_v51  ;;  %v3140_v61 = vld [vmem:[#allocation2 + $0xe8] sm:$0xff] }
  0xe3   :  { %3987 = vmatpush3.bf16.msra.mxu0 %v4607_v51  ;;  %v4279_v42 = vpack.c.bf16 %v3140_v61, %v3139_v3 }
  0xe4   :  { %4187 = vmatpush3.bf16.msra.mxu1 %v4606_v38  ;;  %3988 = vmatprep.subr.bf16.mxu0 %v4609_v26  ;;  %v4636_v38 = vld [vmem:[%s5803_s0 + $0x50] sm:$0xff]  }
  0xe5   :  { %4188 = vmatprep.subr.bf16.mxu1 %v4608_v44  ;;  %v1230_v51 = vrot.slane %v4636_v38, 2  ;;  %v3126_v38 = vld [vmem:[#allocation2 + $0x78] sm:$0xff] }
  0xe6   :  { %3965 = vmatmul.mubr.bf16.gmra.mrb[8].mxu0 %v5294_v54  ;;  %v4613_v54 = vld [vmem:[%s5805_s2 + $0x130] sm:$0xff]  }
  0xe7   :  { %4165 = vmatmul.mubr.bf16.gmra.mrb[8].mxu1 %v5301_v17  ;;  %3968 = vmatprep.mubr.bf16.mxu0 %v5308_v24  ;;  %v4614_v17 = vld [vmem:[%s5805_s2 + $0x278] sm:$0xff]  }
  0xe8   :  { %4168 = vmatprep.mubr.bf16.mxu1 %v5315_v0  ;;  %4189 = vmatpush3.bf16.msra.mxu1 %v4608_v44  ;;  %v4615_v24 = vld [vmem:[%s5805_s2 + $0x138] sm:$0xff]   ;;  %v4620_v0 = vld [vmem:[%s5803_s0] sm:$0xff]  }
  0xe9   :  { %3989 = vmatpush3.bf16.msra.mxu0 %v4609_v26  ;;  %4190 = vmatprep.subr.bf16.mxu1 %v4610_v59  ;;  %v4637_v26 = vld [vmem:[%s5804_s1 + $0x50] sm:$0xff]  }
  0xea   :  { %3990 = vmatprep.subr.bf16.mxu0 %v4611_v53  ;;  %v2738_v44 = vrot.slane %v4637_v26, 2  ;;  %v3218_v26 = vld [vmem:[#allocation2 + $0x100] sm:$0xff] }
  0xec   :  { %4191 = vmatpush3.bf16.msra.mxu1 %v4610_v59  ;;  %v4638_v59 = vld [vmem:[%s5803_s0 + $0x58] sm:$0xff]  }
  0xed   :  { %3991 = vmatpush3.bf16.msra.mxu0 %v4611_v53  ;;  %4192 = vmatprep.subr.bf16.mxu1 %v4612_v56  ;;  %v1232_v53 = vrot.slane %v4638_v59, 2  ;;  %v3220_v59 = vld [vmem:[#allocation2 + $0x110] sm:$0xff] }
  0xee   :  { %3969 = vmatmul.mubr.bf16.gmra.mrb[12].mxu0 %v5323_v41  ;;  %3992 = vmatprep.subr.bf16.mxu0 %v4613_v54  ;;  %v1211_v41 = vrot.slane %v4620_v0, 2 }
  0xef   :  { %4169 = vmatmul.mubr.bf16.gmra.mrb[12].mxu1 %v5332_v6  ;;  %3972 = vmatprep.mubr.bf16.mxu0 %v5341_v46  ;;  %v4621_v6 = vld [vmem:[%s5803_s0 + $0x8] sm:$0xff]   ;;  %v1233_v0 = vsel %vm1210_vm3, %v1230_v51, %v1232_v53 }
  0xf0   :  { %4172 = vmatprep.mubr.bf16.mxu1 %v5349_v37  ;;  %4193 = vmatpush3.bf16.msra.mxu1 %v4612_v56  ;;  %v1212_v46 = vrot.slane %v4621_v6, 2  ;;  %v4622_v37 = vld [vmem:[%s5804_s1] sm:$0xff]   ;;  %v4639_v56 = vld [vmem:[%s5804_s1 + $0x58] sm:$0xff]  }
  0xf1   :  { %3993 = vmatpush3.bf16.msra.mxu0 %v4613_v54  ;;  %4194 = vmatprep.subr.bf16.mxu1 %v4614_v17  ;;  %v2740_v54 = vrot.slane %v4639_v56, 2  ;;  %v4640_v6 = vld [vmem:[%s5803_s0 + $0x60] ss:$0 sps:$4 sm:$0xff]  }
  0xf2   :  { %3994 = vmatprep.subr.bf16.mxu0 %v4615_v24  ;;  %v1215_v16 = vsel %vm1210_vm3, %v1212_v46, %v1214_v63 }
  0xf4   :  { %4195 = vmatpush3.bf16.msra.mxu1 %v4614_v17  ;;  %v1231_v17 = vsel %vm1210_vm3, %v1228_v8, %v1230_v51  ;;  %v3123_v8 = vld [vmem:[#allocation2 + $0x60] sm:$0xff] }
  0xf5   :  { %3995 = vmatpush3.bf16.msra.mxu0 %v4615_v24  ;;  %v2739_v24 = vsel %vm1210_vm3, %v2736_v5, %v2738_v44  ;;  %v4281_v5 = vpack.c.bf16 %v3124_v50, %v3123_v8 }
  0xf6   :  { %3973 = vmatmul.mubr.bf16.gmra.mrb[16].mxu0 %v5356_v25  ;;  %v2719_v25 = vrot.slane %v4622_v37, 2  ;;  %v4641_v37 = vld [vmem:[%s5804_s1 + $0x60] ss:$0 sps:$4 sm:$0xff]  }
  0xf7   :  { %4173 = vmatmul.mubr.bf16.gmra.mrb[16].mxu1 %v5362_v21  ;;  %3976 = vmatprep.mubr.bf16.mxu0 %v5368_v4  ;;  %v4623_v21 = vld [vmem:[%s5804_s1 + $0x8] sm:$0xff]  }
  0xf8   :  { %4176 = vmatprep.mubr.bf16.mxu1 %v5376_v58  ;;  %v2720_v4 = vrot.slane %v4623_v21, 2  ;;  %v1213_v58 = vsel %vm1210_vm3, %v1211_v41, %v1212_v46  ;;  %v2741_v41 = vsel %vm1210_vm3, %v2738_v44, %v2740_v54  ;;  %v1234_v46 = vrot.slane %v4640_v6, 2  ;;  %v3219_v44 = vld [vmem:[#allocation2 + $0x108] sm:$0xff]  ;;  %v3224_v6 = vld [vmem:[#allocation2 + $0x130] sm:$0xff] }
  0xf9   :  { %v4288_v56 = vpack.c.bf16 %v3219_v44, %v3218_v26 }
  0xfa   :  { %v2721_v9 = vsel %vm1210_vm3, %v2719_v25, %v2720_v4  ;;  %v2723_v34 = vsel %vm1210_vm3, %v2720_v4, %v2722_v30  ;;  %v2742_v25 = vrot.slane %v4641_v37, 2  ;;  %v1235_v21 = vsel %vm1210_vm3, %v1232_v53, %v1234_v46  ;;  %v3225_v46 = vld [vmem:[#allocation2 + $0x138] sm:$0xff] }
  0xfb   :  { %v4694_v53 = vmov 0.0|0.0   ;;  %v4297_v37 = vpack.c.bf16 %v3225_v46, %v3224_v6 }
  0xfc   :  { %v2743_v4 = vsel %vm1210_vm3, %v2740_v54, %v2742_v25  ;;  %4287 = vmatprep.subr.bf16.mxu1 %v4694_v53  ;;  %v3221_v54 = vld [vmem:[#allocation2 + $0x118] sm:$0xff]  ;;  %v3226_v25 = vld [vmem:[#allocation2 + $0x140] sm:$0xff] }
  0xfe   :  { %3977 = vmatmul.mubr.bf16.gmra.mrb[20].mxu0 %v5392_v10  ;;  %v2725_v10 = vsel %vm1210_vm3, %v2722_v30, %v2724_v48  ;;  %v3111_v30 = vld [vmem:[#allocation2] sm:$0xff] }
  0xff   :  { %4177 = vmatmul.mubr.bf16.gmra.mrb[20].mxu1 %v5401_v36  ;;  %3996 = vmatprep.mubr.bf16.mxu0 %v1213_v58  ;;  %v4625_v36 = vld [vmem:[%s5804_s1 + $0x20] sm:$0xff]  }
 0x100   :  { %4196 = vmatprep.mubr.bf16.mxu1 %v2721_v9  ;;  %v2726_v22 = vrot.slane %v4625_v36, 2  ;;  %v3127_v58 = vld [vmem:[#allocation2 + $0x80] sm:$0xff]  ;;  %v3128_v9 = vld [vmem:[#allocation2 + $0x88] sm:$0xff] }
 0x101   :  { %v4255_v63 = vpack.c.bf16 %v3128_v9, %v3127_v58  ;;  %v3131_v36 = vld [vmem:[#allocation2 + $0xa0] sm:$0xff]  ;;  %v3228_v58 = vld [vmem:[#allocation2 + $0x150] sm:$0xff]  ;;  %v3229_v9 = vld [vmem:[#allocation2 + $0x158] sm:$0xff] }
 0x102   :  { %v2727_v35 = vsel %vm1210_vm3, %v2724_v48, %v2726_v22  ;;  %v2729_v7 = vsel %vm1210_vm3, %v2726_v22, %v2728_v60  ;;  %v4257_v48 = vpack.c.bf16 %v3112_v55, %v3111_v30  ;;  %v3132_v22 = vld [vmem:[#allocation2 + $0xa8] sm:$0xff]  ;;  %v4265_v60 = vpack.c.bf16 %v3116_v13, %v3115_v12  ;;  %v3230_v30 = vld [vmem:[#allocation2 + $0x160] sm:$0xff] }
 0x103   :  { %4256 = vmatprep.subr.bf16.mxu0 %v4255_v63  ;;  %v4263_v45 = vpack.c.bf16 %v3132_v22, %v3131_v36  ;;  %v4303_v63 = vpack.c.bf16 %v3229_v9, %v3228_v58  ;;  %v3231_v55 = vld [vmem:[#allocation2 + $0x168] sm:$0xff]  ;;  %v5722_v22 = vld [vmem:[%s5809_s6 + $0x10] sm:$0xff] }
 0x104   :  { %v5717_v36 = vld [vmem:[%s5808_s5 + $0x8] sm:$0xff] }
 0x106   :  { %3997 = vmatmul.mubr.bf16.vlgmr.msra.gmra.mrb[0].mxu0 %v1215_v16  ;;  %v3129_v16 = vld [vmem:[#allocation2 + $0x90] sm:$0xff] }
 0x107   :  { %4197 = vmatmul.mubr.bf16.vlgmr.msra.gmra.mrb[0].mxu1 %v2723_v34  ;;  %4000 = vmatprep.mubr.bf16.mxu0 %v1217_v31  ;;  %v3130_v34 = vld [vmem:[#allocation2 + $0x98] sm:$0xff] }
 0x108   :  { %4200 = vmatprep.mubr.bf16.mxu1 %v2725_v10  ;;  %4258 = vmatpush3.bf16.msra.mxu0 %v4257_v48  ;;  %v4259_v31 = vpack.c.bf16 %v3130_v34, %v3129_v16  ;;  %v3113_v10 = vld [vmem:[#allocation2 + $0x10] sm:$0xff]  ;;  %v4306_v48 = vpack.c.bf16 %v3231_v55, %v3230_v30  ;;  %v5702_v16 = vld [vmem:[%s5808_s5] sm:$0xff] }
 0x109   :  { %v4261_v23 = vpack.c.bf16 %v3114_v27, %v3113_v10  ;;  %4289 = vmatpush3.bf16.msra.mxu1 %v4288_v56  ;;  %v5712_v10 = vld [vmem:[%s5808_s5 + $0x10] sm:$0xff] }
 0x10a   :  { %4260 = vmatprep.subr.bf16.mxu0 %v4259_v31  ;;  %4290 = vmatprep.subr.bf16.mxu1 %v4694_v53  ;;  %v5707_v31 = vld [vmem:[%s5809_s6] sm:$0xff] }
 0x10c   :  { %4262 = vmatpush3.bf16.msra.mxu0 %v4261_v23 }
 0x10d   :  { %4264 = vmatprep.subr.bf16.mxu0 %v4263_v45 }
 0x10e   :  { %4001 = vmatmul.mubr.bf16.gmra.mrb[4].mxu0 %v1219_v14  ;;  %v3133_v14 = vld [vmem:[#allocation2 + $0xb0] sm:$0xff] }
 0x10f   :  { %4201 = vmatmul.mubr.bf16.gmra.mrb[4].mxu1 %v2727_v35  ;;  %4004 = vmatprep.mubr.bf16.mxu0 %v1221_v19  ;;  %v3134_v35 = vld [vmem:[#allocation2 + $0xb8] sm:$0xff] }
 0x110   :  { %4204 = vmatprep.mubr.bf16.mxu1 %v2729_v7  ;;  %4266 = vmatpush3.bf16.msra.mxu0 %v4265_v60  ;;  %v4267_v19 = vpack.c.bf16 %v3134_v35, %v3133_v14  ;;  %v3117_v7 = vld [vmem:[#allocation2 + $0x30] sm:$0xff]  ;;  %v5728_v60 = vld [vmem:[%s5809_s6 + $0x8] sm:$0xff] }
 0x111   :  { %v4269_v40 = vpack.c.bf16 %v3118_v2, %v3117_v7 }
 0x112   :  { %4268 = vmatprep.subr.bf16.mxu0 %v4267_v19 }
 0x114   :  { %4270 = vmatpush3.bf16.msra.mxu0 %v4269_v40 }
 0x115   :  { %4272 = vmatprep.subr.bf16.mxu0 %v4271_v39 }
 0x116   :  { %4005 = vmatmul.mubr.bf16.gmra.mrb[8].mxu0 %v1223_v18  ;;  %v3137_v18 = vld [vmem:[#allocation2 + $0xd0] sm:$0xff] }
 0x117   :  { %4205 = vmatmul.mubr.bf16.gmra.mrb[8].mxu1 %v2731_v57  ;;  %4008 = vmatprep.mubr.bf16.mxu0 %v1225_v15  ;;  %v3138_v57 = vld [vmem:[#allocation2 + $0xd8] sm:$0xff] }
 0x118   :  { %4208 = vmatprep.mubr.bf16.mxu1 %v2733_v49  ;;  %4274 = vmatpush3.bf16.msra.mxu0 %v4273_v1  ;;  %v4275_v15 = vpack.c.bf16 %v3138_v57, %v3137_v18  ;;  %v3121_v49 = vld [vmem:[#allocation2 + $0x50] sm:$0xff] }
 0x119   :  { %v4277_v47 = vpack.c.bf16 %v3122_v29, %v3121_v49 }
 0x11a   :  { %4276 = vmatprep.subr.bf16.mxu0 %v4275_v15 }
 0x11c   :  { %4278 = vmatpush3.bf16.msra.mxu0 %v4277_v47 }
 0x11d   :  { %4280 = vmatprep.subr.bf16.mxu0 %v4279_v42 }
 0x11e   :  { %4009 = vmatmul.mubr.bf16.gmra.mrb[12].mxu0 %v1227_v33  ;;  %v3141_v33 = vld [vmem:[#allocation2 + $0xf0] sm:$0xff] }
 0x11f   :  { %4209 = vmatmul.mubr.bf16.gmra.mrb[12].mxu1 %v2735_v11  ;;  %4012 = vmatprep.mubr.bf16.mxu0 %v1229_v43  ;;  %v3142_v11 = vld [vmem:[#allocation2 + $0xf8] sm:$0xff]  ;;  %v3125_v43 = vld [vmem:[#allocation2 + $0x70] sm:$0xff] }
 0x120   :  { %4212 = vmatprep.mubr.bf16.mxu1 %v2737_v52  ;;  %4282 = vmatpush3.bf16.msra.mxu0 %v4281_v5  ;;  %v4283_v52 = vpack.c.bf16 %v3142_v11, %v3141_v33  ;;  %v4285_v51 = vpack.c.bf16 %v3126_v38, %v3125_v43 }
 0x122   :  { %4284 = vmatprep.subr.bf16.mxu0 %v4283_v52 }
 0x124   :  { %4286 = vmatpush3.bf16.msra.mxu0 %v4285_v51 }
 0x126   :  { %4013 = vmatmul.mubr.bf16.gmra.mrb[16].mxu0 %v1231_v17  ;;  %v4291_v17 = vpack.c.bf16 %v3221_v54, %v3220_v59 }
 0x127   :  { %4213 = vmatmul.mubr.bf16.gmra.mrb[16].mxu1 %v2739_v24  ;;  %4016 = vmatprep.mubr.bf16.mxu0 %v1233_v0  ;;  %v3222_v24 = vld [vmem:[#allocation2 + $0x120] sm:$0xff]  ;;  %v3223_v0 = vld [vmem:[#allocation2 + $0x128] sm:$0xff] }
 0x128   :  { %4216 = vmatprep.mubr.bf16.mxu1 %v2741_v41  ;;  %4292 = vmatpush3.bf16.msra.mxu1 %v4291_v17  ;;  %v4294_v41 = vpack.c.bf16 %v3223_v0, %v3222_v24 }
 0x129   :  { %4293 = vmatprep.subr.bf16.mxu1 %v4694_v53 }
 0x12c   :  { %4295 = vmatpush3.bf16.msra.mxu1 %v4294_v41 }
 0x12d   :  { %4296 = vmatprep.subr.bf16.mxu1 %v4694_v53 }
 0x12e   :  { %4017 = vmatmul.mubr.bf16.gmra.mrb[20].mxu0 %v1235_v21  ;;  %v3227_v21 = vld [vmem:[#allocation2 + $0x148] sm:$0xff] }
 0x12f   :  { %4217 = vmatmul.mubr.bf16.gmra.mrb[20].mxu1 %v2743_v4  ;;  %v4300_v4 = vpack.c.bf16 %v3227_v21, %v3226_v25 }
 0x130   :  { %4298 = vmatpush3.bf16.msra.mxu1 %v4297_v37 }
 0x131   :  { %4299 = vmatprep.subr.bf16.mxu1 %v4694_v53 }
 0x134   :  { %4301 = vmatpush3.bf16.msra.mxu1 %v4300_v4 }
 0x135   :  { %4302 = vmatprep.subr.bf16.mxu1 %v4694_v53 }
 0x138   :  { %4304 = vmatpush3.bf16.msra.mxu1 %v4303_v63 }
 0x139   :  { %4305 = vmatprep.subr.bf16.mxu1 %v4694_v53 }
 0x13c   :  { %4307 = vmatpush3.bf16.msra.mxu1 %v4306_v48 }
 0x13d   :  { %4308 = vmatprep.subr.bf16.mxu1 %v4694_v53 }
 0x1d9   :  { %v3998_v34 = vpop.f32.mrb[0].mxu0 }
 0x1da   :  { %v4198_v27 = vpop.f32.mrb[0].mxu1  ;;  %v1330_v23 = vpop.f32.mrb[1].mxu0  ;;  %v1454_v7 = vadd.f32 %v3998_v34, %v5712_v10 }
 0x1db   :  { %v1452_v45 = vadd.f32 %v5702_v16, %v1330_v23  ;;  %v2838_v12 = vpop.f32.mrb[1].mxu1  ;;  %v3999_v13 = vpop.f32.mrb[2].mxu0  ;;  %v2962_v20 = vadd.f32 %v4198_v27, %v5722_v22 }
 0x1dc   :  { %v2960_v14 = vadd.f32 %v5707_v31, %v2838_v12  ;;  %v4199_v35 = vpop.f32.mrb[2].mxu1  ;;  %v1333_v19 = vpop.f32.mrb[3].mxu0  ;;  %v1455_v62 = vadd.f32 %v3999_v13, %v5702_v16  ;;  %v1478_v15 = vmax.f32 %v1454_v7, 0.0 }
 0x1dd   :  { %v1453_v2 = vadd.f32 %v5717_v36, %v1333_v19  ;;  %v2841_v40 = vpop.f32.mrb[3].mxu1  ;;  %v1476_v32 = vmax.f32 %v1452_v45, 0.0  ;;  %v2963_v28 = vadd.f32 %v4199_v35, %v5707_v31  ;;  %v2986_v47 = vmax.f32 %v2962_v20, 0.0 }
 0x1de   :  { %v2961_v39 = vadd.f32 %v5728_v60, %v2841_v40  ;;  %v2984_v18 = vmax.f32 %v2960_v14, 0.0  ;;  %v1479_v3 = vmax.f32 %v1455_v62, 0.0 }
 0x1df   :  { %v1477_v1 = vmax.f32 %v1453_v2, 0.0  ;;  %v2987_v5 = vmax.f32 %v2963_v28, 0.0 }
 0x1e0   :  { %v2985_v57 = vmax.f32 %v2961_v39, 0.0 }
 0x1e1   :  { %v1500_v49 = vmax.f32 %v1476_v32, %v1477_v1  ;;  %v4002_v29 = vpop.f32.mrb[4].mxu0 }
 0x1e2   :  { %v3008_v61 = vmax.f32 %v2984_v18, %v2985_v57  ;;  %v1458_v42 = vadd.f32 %v4002_v29, %v5702_v16  ;;  %v4202_v8 = vpop.f32.mrb[4].mxu1  ;;  %v1346_v50 = vpop.f32.mrb[5].mxu0 }
 0x1e3   :  { %v1501_v33 = vmax.f32 %v1500_v49, %v1478_v15  ;;  %v2966_v11 = vadd.f32 %v4202_v8, %v5707_v31  ;;  %v1456_v43 = vadd.f32 %v5717_v36, %v1346_v50  ;;  %v2854_v52 = vpop.f32.mrb[5].mxu1  ;;  %v4003_v38 = vpop.f32.mrb[6].mxu0 }
 0x1e4   :  { %v3009_v51 = vmax.f32 %v3008_v61, %v2986_v47  ;;  %v1482_v26 = vmax.f32 %v1458_v42, 0.0  ;;  %v2964_v44 = vadd.f32 %v5728_v60, %v2854_v52  ;;  %v1459_v59 = vadd.f32 %v4003_v38, %v5717_v36  ;;  %v4203_v53 = vpop.f32.mrb[6].mxu1  ;;  %v1349_v56 = vpop.f32.mrb[7].mxu0 }
 0x1e5   :  { %v1502_v54 = vrot.slane %v1501_v33, 4  ;;  %v2990_v17 = vmax.f32 %v2966_v11, 0.0  ;;  %v1480_v24 = vmax.f32 %v1456_v43, 0.0  ;;  %v2967_v0 = vadd.f32 %v4203_v53, %v5728_v60  ;;  %v2857_v41 = vpop.f32.mrb[7].mxu1 }
 0x1e6   :  { %v3010_v6 = vrot.slane %v3009_v51, 4  ;;  %v2988_v46 = vmax.f32 %v2964_v44, 0.0  ;;  %v1483_v37 = vmax.f32 %v1459_v59, 0.0  ;;  %v1457_v25 = vadd.f32 %v5712_v10, %v1349_v56 }
 0x1e7   :  { %v1503_v21 = vmax.f32 %v1501_v33, %v1502_v54  ;;  %v1508_v4 = vmax.f32 %v1479_v3, %v1480_v24  ;;  %v2991_v58 = vmax.f32 %v2967_v0, 0.0  ;;  %v2965_v9 = vadd.f32 %v5722_v22, %v2857_v41 }
 0x1e8   :  { %v3011_v63 = vmax.f32 %v3009_v51, %v3010_v6  ;;  %v3016_v30 = vmax.f32 %v2987_v5, %v2988_v46  ;;  %v1516_v55 = vmax.f32 %v1482_v26, %v1483_v37  ;;  %v1481_v48 = vmax.f32 %v1457_v25, 0.0 }
 0x1e9   :  { %v1504_v34 = vrot.slane %v1503_v21, 2  ;;  %v3024_v27 = vmax.f32 %v2990_v17, %v2991_v58  ;;  %v2989_v23 = vmax.f32 %v2965_v9, 0.0  ;;  %v4006_v45 = vpop.f32.mrb[8].mxu0 }
 0x1ea   :  { %v3012_v12 = vrot.slane %v3011_v63, 2  ;;  %v1509_v13 = vmax.f32 %v1508_v4, %v1481_v48  ;;  %v1462_v14 = vadd.f32 %v4006_v45, %v5717_v36  ;;  %v4206_v35 = vpop.f32.mrb[8].mxu1  ;;  %v1362_v19 = vpop.f32.mrb[9].mxu0 }
 0x1eb   :  { %v1505_v7 = vmax.f32 %v1503_v21, %v1504_v34  ;;  %v3017_v2 = vmax.f32 %v3016_v30, %v2989_v23  ;;  %v2970_v40 = vadd.f32 %v4206_v35, %v5728_v60  ;;  %v1460_v20 = vadd.f32 %v5712_v10, %v1362_v19  ;;  %v2870_v62 = vpop.f32.mrb[9].mxu1  ;;  %v4007_v39 = vpop.f32.mrb[10].mxu0 }
 0x1ec   :  { %v3013_v32 = vmax.f32 %v3011_v63, %v3012_v12  ;;  %v1510_v28 = vrot.slane %v1509_v13, 4  ;;  %v1486_v1 = vmax.f32 %v1462_v14, 0.0  ;;  %v2968_v18 = vadd.f32 %v5722_v22, %v2870_v62  ;;  %v4207_v57 = vpop.f32.mrb[10].mxu1  ;;  %v1365_v15 = vpop.f32.mrb[11].mxu0 }
 0x1ed   :  { %v1506_v49 = vrot.slane %v1505_v7, 1  ;;  %v3018_v29 = vrot.slane %v3017_v2, 4  ;;  %v2994_v47 = vmax.f32 %v2970_v40, 0.0  ;;  %v1484_v3 = vmax.f32 %v1460_v20, 0.0  ;;  %v2873_v61 = vpop.f32.mrb[11].mxu1 }
 0x1ee   :  { %v3014_v42 = vrot.slane %v3013_v32, 1  ;;  %v1511_v8 = vmax.f32 %v1509_v13, %v1510_v28  ;;  %v2992_v50 = vmax.f32 %v2968_v18, 0.0  ;;  %v1463_v5 = vadd.f32 %v4007_v39, %v5712_v10 }
 0x1ef   :  { %v1507_v33 = vmax.f32 %v1505_v7, %v1506_v49  ;;  %v3019_v11 = vmax.f32 %v3017_v2, %v3018_v29  ;;  %v1517_v43 = vmax.f32 %v1516_v55, %v1484_v3  ;;  %v2971_v52 = vadd.f32 %v4207_v57, %v5722_v22 }
 0x1f0   :  { %v3015_v38 = vmax.f32 %v3013_v32, %v3014_v42  ;;  %v1512_v51 = vrot.slane %v1511_v8, 2  ;;  %v3025_v26 = vmax.f32 %v3024_v27, %v2992_v50  ;;  %v1487_v44 = vmax.f32 %v1463_v5, 0.0 }
 0x1f1   :  { %v3020_v59 = vrot.slane %v3019_v11, 2  ;;  %v1518_v53 = vrot.slane %v1517_v43, 4  ;;  %v2995_v56 = vmax.f32 %v2971_v52, 0.0  ;;  %v1461_v54 = vadd.f32 %v5702_v16, %v1365_v15  ;;  %v4010_v17 = vpop.f32.mrb[12].mxu0 }
 0x1f2   :  { %v1513_v24 = vmax.f32 %v1511_v8, %v1512_v51  ;;  %v3026_v0 = vrot.slane %v3025_v26, 4  ;;  %v2969_v41 = vadd.f32 %v5707_v31, %v2873_v61  ;;  %v5754_v6 = vadd.f32 %v4010_v17, %v5712_v10  ;;  %v4210_v46 = vpop.f32.mrb[12].mxu1  ;;  %v1378_v37 = vpop.f32.mrb[13].mxu0 }
 0x1f3   :  { %v3021_v25 = vmax.f32 %v3019_v11, %v3020_v59  ;;  %v1519_v21 = vmax.f32 %v1517_v43, %v1518_v53  ;;  %v1485_v4 = vmax.f32 %v1461_v54, 0.0  ;;  %v5757_v58 = vadd.f32 %v4210_v46, %v5722_v22  ;;  %v2886_v9 = vpop.f32.mrb[13].mxu1  ;;  %v4011_v63 = vpop.f32.mrb[14].mxu0 }
 0x1f4   :  { %v1514_v30 = vrot.slane %v1513_v24, 1  ;;  %v3027_v55 = vmax.f32 %v3025_v26, %v3026_v0  ;;  %v2993_v48 = vmax.f32 %v2969_v41, 0.0  ;;  %v1490_v34 = vmax.f32 %v5754_v6, 0.0  ;;  %v4211_v27 = vpop.f32.mrb[14].mxu1  ;;  %v1381_v23 = vpop.f32.mrb[15].mxu0 }
 0x1f5   :  { %v3022_v45 = vrot.slane %v3021_v25, 1  ;;  %v1520_v12 = vrot.slane %v1519_v21, 2  ;;  %v1524_v13 = vmax.f32 %v1485_v4, %v1486_v1  ;;  %v2998_v14 = vmax.f32 %v5757_v58, 0.0  ;;  %v2889_v35 = vpop.f32.mrb[15].mxu1 }
 0x1f6   :  { %v1515_v19 = vmax.f32 %v1513_v24, %v1514_v30  ;;  %v3028_v7 = vrot.slane %v3027_v55, 2  ;;  %v3032_v2 = vmax.f32 %v2993_v48, %v2994_v47  ;;  %v1464_v40 = vadd.f32 %v5702_v16, %v1378_v37 }
 0x1f7   :  { %v3023_v20 = vmax.f32 %v3021_v25, %v3022_v45  ;;  %v1521_v62 = vmax.f32 %v1519_v21, %v1520_v12  ;;  %v1525_v39 = vmax.f32 %v1524_v13, %v1487_v44  ;;  %v2972_v32 = vadd.f32 %v5707_v31, %v2886_v9 }
 0x1f8   :  { %v3081_v28 = vsel %vm3080_vm4, %v1515_v19, %v1507_v33  ;;  %v3029_v18 = vmax.f32 %v3027_v55, %v3028_v7  ;;  %v3033_v57 = vmax.f32 %v3032_v2, %v2995_v56  ;;  %v1488_v15 = vmax.f32 %v1464_v40, 0.0 }
 0x1f9   :  { %v5765_v1 = vsel %vm3080_vm4, %v3023_v20, %v3015_v38  ;;  %v1522_v49 = vrot.slane %v1521_v62, 1  ;;  %v1526_v29 = vrot.slane %v1525_v39, 4  ;;  %v2996_v3 = vmax.f32 %v2972_v32, 0.0  ;;  %v4014_v61 = vpop.f32.mrb[16].mxu0 }
 0x1fa   :  { %v3030_v47 = vrot.slane %v3029_v18, 1  ;;  %v3034_v42 = vrot.slane %v3033_v57, 4  ;;  %v1467_v8 = vadd.f32 %v4011_v63, %v5702_v16  ;;  %v2975_v50 = vadd.f32 %v4211_v27, %v5707_v31  ;;  %v4214_v5 = vpop.f32.mrb[16].mxu1  ;;  %v1394_v11 = vpop.f32.mrb[17].mxu0 }
 0x1fb   :  { %v1523_v43 = vmax.f32 %v1521_v62, %v1522_v49  ;;  %v1527_v33 = vmax.f32 %v1525_v39, %v1526_v29  ;;  %v1465_v52 = vadd.f32 %v5717_v36, %v1381_v23  ;;  %v2973_v51 = vadd.f32 %v5728_v60, %v2889_v35  ;;  %v2902_v38 = vpop.f32.mrb[17].mxu1  ;;  %v4015_v26 = vpop.f32.mrb[18].mxu0 }
 0x1fc   :  { %v5771_v44 = vmax.f32 %v3029_v18, %v3030_v47  ;;  %v3035_v59 = vmax.f32 %v3033_v57, %v3034_v42  ;;  %v1491_v53 = vmax.f32 %v1467_v8, 0.0  ;;  %v2999_v56 = vmax.f32 %v2975_v50, 0.0  ;;  %v4215_v54 = vpop.f32.mrb[18].mxu1  ;;  %v1397_v17 = vpop.f32.mrb[19].mxu0 }
 0x1fd   :  { %v5774_v24 = vsel %vm3082_vm5, %v1523_v43, %v3081_v28  ;;  %v1528_v0 = vrot.slane %v1527_v33, 2  ;;  %v1489_v41 = vmax.f32 %v1465_v52, 0.0  ;;  %v2997_v6 = vmax.f32 %v2973_v51, 0.0  ;;  %v2905_v46 = vpop.f32.mrb[19].mxu1 }
 0x1fe   :  { %v3036_v37 = vrot.slane %v3035_v59, 2  ;;  %v1470_v25 = vadd.f32 %v4014_v61, %v5702_v16  ;;  %v2978_v21 = vadd.f32 %v4214_v5, %v5707_v31  ;;  %v1468_v4 = vadd.f32 %v5717_v36, %v1394_v11 }
 0x1ff   :  { %v1529_v58 = vmax.f32 %v1527_v33, %v1528_v0  ;;  %v1532_v9 = vmax.f32 %v1488_v15, %v1489_v41  ;;  %v3040_v63 = vmax.f32 %v2996_v3, %v2997_v6  ;;  %v2976_v30 = vadd.f32 %v5728_v60, %v2902_v38 }
 0x200   :  { %v3037_v55 = vmax.f32 %v3035_v59, %v3036_v37  ;;  %v1494_v48 = vmax.f32 %v1470_v25, 0.0  ;;  %v3002_v27 = vmax.f32 %v2978_v21, 0.0  ;;  %v1492_v23 = vmax.f32 %v1468_v4, 0.0 }
 0x201   :  { %v1530_v45 = vrot.slane %v1529_v58, 1  ;;  %v1533_v12 = vmax.f32 %v1532_v9, %v1490_v34  ;;  %v3041_v13 = vmax.f32 %v3040_v63, %v2998_v14  ;;  %v3000_v35 = vmax.f32 %v2976_v30, 0.0  ;;  %v4018_v19 = vpop.f32.mrb[20].mxu0 }
 0x202   :  { %v3038_v7 = vrot.slane %v3037_v55, 1  ;;  %v1540_v2 = vmax.f32 %v1491_v53, %v1492_v23  ;;  %v1471_v40 = vadd.f32 %v4015_v26, %v5717_v36  ;;  %v2979_v20 = vadd.f32 %v4215_v54, %v5728_v60  ;;  %v4218_v62 = vpop.f32.mrb[20].mxu1  ;;  %v1410_v39 = vpop.f32.mrb[21].mxu0 }
 0x203   :  { %v1531_v32 = vmax.f32 %v1529_v58, %v1530_v45  ;;  %v1534_v28 = vrot.slane %v1533_v12, 4  ;;  %v3042_v18 = vrot.slane %v3041_v13, 4  ;;  %v3048_v57 = vmax.f32 %v2999_v56, %v3000_v35  ;;  %v2918_v15 = vpop.f32.mrb[21].mxu1  ;;  %v4019_v49 = vpop.f32.mrb[22].mxu0 }
 0x204   :  { %v3039_v29 = vmax.f32 %v3037_v55, %v3038_v7  ;;  %v1495_v3 = vmax.f32 %v1471_v40, 0.0  ;;  %v3003_v34 = vmax.f32 %v2979_v20, 0.0  ;;  %v1469_v14 = vadd.f32 %v5712_v10, %v1397_v17  ;;  %v4219_v61 = vpop.f32.mrb[22].mxu1  ;;  %v1413_v47 = vpop.f32.mrb[23].mxu0 }
 0x205   :  { %v1535_v42 = vmax.f32 %v1533_v12, %v1534_v28  ;;  %v3043_v8 = vmax.f32 %v3041_v13, %v3042_v18  ;;  %v2977_v50 = vadd.f32 %v5722_v22, %v2905_v46  ;;  %v1474_v5 = vadd.f32 %v4018_v19, %v5717_v36  ;;  %v2921_v11 = vpop.f32.mrb[23].mxu1 }
 0x206   :  { %v1548_v43 = vmax.f32 %v1494_v48, %v1495_v3  ;;  %v3056_v33 = vmax.f32 %v3002_v27, %v3003_v34  ;;  %v1493_v52 = vmax.f32 %v1469_v14, 0.0  ;;  %v2982_v51 = vadd.f32 %v4218_v62, %v5728_v60 }
 0x207   :  { %v1536_v38 = vrot.slane %v1535_v42, 2  ;;  %v3044_v26 = vrot.slane %v3043_v8, 2  ;;  %v3001_v59 = vmax.f32 %v2977_v50, 0.0  ;;  %v1498_v53 = vmax.f32 %v1474_v5, 0.0 }
 0x208   :  { %v1541_v56 = vmax.f32 %v1540_v2, %v1493_v52  ;;  %v3006_v54 = vmax.f32 %v2982_v51, 0.0  ;;  %v1472_v17 = vadd.f32 %v5712_v10, %v1410_v39  ;;  %v2980_v0 = vadd.f32 %v5722_v22, %v2918_v15 }
 0x209   :  { %v1537_v41 = vmax.f32 %v1535_v42, %v1536_v38  ;;  %v3045_v6 = vmax.f32 %v3043_v8, %v3044_v26  ;;  %v3049_v36 = vmax.f32 %v3048_v57, %v3001_v59  ;;  %v1475_v46 = vadd.f32 %v4019_v49, %v5712_v10 }
 0x20a   :  { %v1542_v37 = vrot.slane %v1541_v56, 4  ;;  %v1496_v25 = vmax.f32 %v1472_v17, 0.0  ;;  %v3004_v21 = vmax.f32 %v2980_v0, 0.0  ;;  %v2983_v60 = vadd.f32 %v4219_v61, %v5722_v22 }
 0x20b   :  { %v1538_v4 = vrot.slane %v1537_v41, 1  ;;  %v3046_v58 = vrot.slane %v3045_v6, 1  ;;  %v3050_v9 = vrot.slane %v3049_v36, 4  ;;  %v1499_v63 = vmax.f32 %v1475_v46, 0.0 }
 0x20c   :  { %v1543_v30 = vmax.f32 %v1541_v56, %v1542_v37  ;;  %v1549_v55 = vmax.f32 %v1548_v43, %v1496_v25  ;;  %v3057_v48 = vmax.f32 %v3056_v33, %v3004_v21  ;;  %v3007_v27 = vmax.f32 %v2983_v60, 0.0  ;;  %v3232_v21 = vld [vmem:[#allocation2 + $0x170] sm:$0xff]  ;;  %v3233_v60 = vld [vmem:[#allocation2 + $0x178] sm:$0xff] }
 0x20d   :  { %v1539_v23 = vmax.f32 %v1537_v41, %v1538_v4  ;;  %v3047_v45 = vmax.f32 %v3045_v6, %v3046_v58  ;;  %v3051_v12 = vmax.f32 %v3049_v36, %v3050_v9  ;;  %v1473_v13 = vadd.f32 %v5702_v16, %v1413_v47 }
 0x20e   :  { %v1544_v35 = vrot.slane %v1543_v30, 2  ;;  %v1550_v10 = vrot.slane %v1549_v55, 4  ;;  %v3058_v19 = vrot.slane %v3057_v48, 4  ;;  %v2981_v7 = vadd.f32 %v5707_v31, %v2921_v11 }
 0x20f   :  { %v3052_v2 = vrot.slane %v3051_v12, 2  ;;  %v1497_v22 = vmax.f32 %v1473_v13, 0.0  ;;  %v3104_v40 = vsel %vm3082_vm5, %v5771_v44, %v5765_v1  ;;  %v3085_v20 = vsel %vm3084_vm6, %v1531_v32, %v5774_v24 }
 0x210   :  { %v1545_v62 = vmax.f32 %v1543_v30, %v1544_v35  ;;  %v1551_v39 = vmax.f32 %v1549_v55, %v1550_v10  ;;  %v3059_v28 = vmax.f32 %v3057_v48, %v3058_v19  ;;  %v3005_v18 = vmax.f32 %v2981_v7, 0.0 }
 0x211   :  { %v3053_v57 = vmax.f32 %v3051_v12, %v3052_v2  ;;  %v1556_v16 = vmax.f32 %v1497_v22, %v1498_v53  ;;  %v3105_v15 = vsel %vm3084_vm6, %v3039_v29, %v3104_v40  ;;  %v3087_v49 = vsel %vm3086_vm7, %v1539_v23, %v3085_v20 }
 0x212   :  { %v1546_v31 = vrot.slane %v1545_v62, 1  ;;  %v1552_v3 = vrot.slane %v1551_v39, 2  ;;  %v3060_v34 = vrot.slane %v3059_v28, 2  ;;  %v3064_v14 = vmax.f32 %v3005_v18, %v3006_v54 }
 0x213   :  { %v3054_v61 = vrot.slane %v3053_v57, 1  ;;  %v1557_v47 = vmax.f32 %v1556_v16, %v1499_v63  ;;  %v3106_v1 = vsel %vm3086_vm7, %v3047_v45, %v3105_v15  ;;  %v4309_v4 = vpack.c.bf16 %v3233_v60, %v3232_v21  ;;  %v3566_v63 = vld [vmem:[#allocation4] ss:$0 sm:$0xff] }
 0x214   :  { %v1547_v44 = vmax.f32 %v1545_v62, %v1546_v31  ;;  %v1553_v24 = vmax.f32 %v1551_v39, %v1552_v3  ;;  %v3061_v32 = vmax.f32 %v3059_v28, %v3060_v34  ;;  %v3065_v42 = vmax.f32 %v3064_v14, %v3007_v27  ;;  %v3567_v27 = vld [vmem:[#allocation4 + $0x1] ss:$0 sm:$0xff] }
 0x215   :  { %v3055_v8 = vmax.f32 %v3053_v57, %v3054_v61  ;;  %v1558_v50 = vrot.slane %v1557_v47, 4  ;;  %v4696_v58 = vmov 0.0   ;;  %4310 = vmatpush3.bf16.msra.mxu1 %v4309_v4 }
 0x216   :  { %v1554_v5 = vrot.slane %v1553_v24, 1  ;;  %v3062_v11 = vrot.slane %v3061_v32, 1  ;;  %v3066_v29 = vrot.slane %v3065_v42, 4  ;;  %v3089_v43 = vsel %vm3088_vm8, %v1547_v44, %v3087_v49  ;;  %4252 = vmatprep.mubr.msk.f32.mxu1 %vm4695_vm11, %v4696_v58 }
 0x217   :  { %v1559_v33 = vmax.f32 %v1557_v47, %v1558_v50  ;;  %v3107_v52 = vsel %vm3088_vm8, %v3055_v8, %v3106_v1 }
 0x218   :  { %v1555_v51 = vmax.f32 %v1553_v24, %v1554_v5  ;;  %v3067_v38 = vmax.f32 %v3065_v42, %v3066_v29  ;;  %v3063_v26 = vmax.f32 %v3061_v32, %v3062_v11 }
 0x219   :  { %v1560_v59 = vrot.slane %v1559_v33, 2 }
 0x21a   :  { %v3068_v53 = vrot.slane %v3067_v38, 2  ;;  %v3108_v56 = vsel %vm3090_vm9, %v3063_v26, %v3107_v52  ;;  %v3091_v54 = vsel %vm3090_vm9, %v1555_v51, %v3089_v43 }
 0x21b   :  { %v1561_v17 = vmax.f32 %v1559_v33, %v1560_v59 }
 0x21c   :  { %v3069_v0 = vmax.f32 %v3067_v38, %v3068_v53 }
 0x21d   :  { %v1562_v41 = vrot.slane %v1561_v17, 1 }
 0x21e   :  { %v3070_v6 = vrot.slane %v3069_v0, 1 }
 0x21f   :  { %v1563_v36 = vmax.f32 %v1561_v17, %v1562_v41 }
 0x220   :  { %v3071_v46 = vmax.f32 %v3069_v0, %v3070_v6 }
 0x221   :  { %v3093_v37 = vsel %vm3092_vm10, %v1563_v36, %v3091_v54 }
 0x222   :  { %v3109_v25 = vsel %vm3092_vm10, %v3071_v46, %v3108_v56 }
 0x223   :  { %3212 = vmatprep.mubr.f32.mxu0 %v3109_v25 }
 0x224   :  { %3213 = vmatmul.mubr.f32.vlgmr.msra.gmra.mrb[24].mxu0 %v3093_v37 }
 0x2f7   :  { %v3800_v9 = vpop.f32.mrb[24].mxu0 }
 0x2f8   :  { %v3801_v30 = vpop.f32.mrb[25].mxu0 }
 0x2f9   :  { %v3802_v55 = vadd.f32 %v3801_v30, %v3800_v9 }
 0x2fb   :  { %v3215_v48 = vadd.f32 %v3802_v55, %v3566_v63 }
 0x2fd   :  { %4253 = vmatmul.mubr.f32.vlgmr.msra.gmra.mrb[24].mxu1 %v3215_v48 }
 0x3d0   :  { %v3305_v23 = vpop.f32.mrb[24].mxu1 }
 0x3d1   :  { %v3306_v45 = vadd.f32 %v3567_v27, %v3305_v23  ;;  %v4254_v12 = vpop.f32.mrb[25].mxu1 }
 0x3d3   :  { %3309 = vst [vmem:[%s5810_s7] sm:$0xff] %v3306_v45 }
 0x3d4   :  { %3314 = vsyncpa [#allocation3], 1 }
 0x3d5   :  { %3315 = vsyncpa [#allocation5], 1 }

</bundles_post_ra>
